<compile_context>
chip_gen: v5e
topology: v5e:2x2
jax: 0.10.0
libtpu: 0.0.40
codegen_flags: <defaults>
</compile_context>

<pallas_src>
import math

import jax
import jax.numpy as jnp
from jax.experimental import pallas as pl
from jax.experimental.pallas import tpu as pltpu

# Small, deterministic synthetic config (consistent with the module's __init__).
B, S, D = 2, 8, 32          # batch, sequence length, d_model
BS = B * S
HEADS = 4
DK = D // HEADS
N_LAYERS = 2                # N
D_FF = 64                   # FeedForward hidden size (tutorial default 2048, scaled down)
VOCAB = 16                  # vocab_size (embedX contribution is multiplied by 0 in forward)
MAX_LEN = 1024              # max_length for positional Embedder
EPS = 1e-6
NEG_INF = -1e9              # matches torch masked_fill(mask == 0, -1e9)

# ---- packed-parameter layouts ---------------------------------------------------------
# w_slab: (N_LAYERS, D, W_SLAB_WIDTH); every segment starts at a multiple of 128 lanes so
# each weight slice is an aligned, zero-cost view for the MXU.
W_Q = 0            # width D   (LN1-alpha and 1/sqrt(dk) folded in)
W_K = 128          # width D   (LN1-alpha folded in)
W_V = 256          # width D   (LN1-alpha folded in)
W_O = 384          # width D
W_1 = 512          # width D_FF (LN2-alpha folded in)
W_SLAB_WIDTH = 640
# vec_slab: (N_LAYERS, VEC_ROWS, 128); one bias vector per row, lane-0 aligned.
R_BQ, R_BK, R_BV, R_BO, R_B1, R_B2 = 0, 1, 2, 3, 4, 5
VEC_ROWS = 8       # padded to a full sublane tile


def _center_scale(v):
    # torch Norm core: (v - mean) / (std + eps) with unbiased std (ddof=1).
    # alpha / bias are folded into the following projection (pre-norm) or applied by caller.
    n = v.shape[-1]
    mean = jnp.sum(v, axis=-1, keepdims=True) * (1.0 / n)
    d = v - mean
    var = jnp.sum(d * d, axis=-1, keepdims=True) * (1.0 / (n - 1))
    return d * pl.reciprocal(jnp.sqrt(var) + EPS, approx=False)


def decoder_kernel(x_ref, bias_ref, hsel_ref, w_ref, w2_ref, vec_ref, lnf_ref, out_ref):
    x = x_ref[...]                     # (BS, D); positional embedding already added
    attn_bias = bias_ref[...]          # (BS, HEADS*BS) additive mask bias, hoisted once
    hsel = hsel_ref[...]               # (HEADS*BS, D) head-selection / denom-sum matrix

    for l in range(N_LAYERS):          # static unroll over layers
        # ---------------- self-attention sub-layer (pre-norm folded into weights) -------
        z = _center_scale(x)
        # Fused QKV projection: one (BS, D) x (D, 384) matmul against the aligned slab.
        # q / k / v land at lane offsets 0 / 128 / 256 -> aligned slices, no lane rotates.
        qkv = jnp.dot(z, w_ref[l, :, W_Q:W_O], preferred_element_type=jnp.float32)
        q = qkv[:, W_Q:W_Q + D] + vec_ref[l, R_BQ, :D]      # 1/sqrt(dk) folded in
        k = qkv[:, W_K:W_K + D] + vec_ref[l, R_BK, :D]
        v = qkv[:, W_V:W_V + D] + vec_ref[l, R_BV, :D]

        # Block-diagonal-over-heads attention: heads never leave the lane axis.
        k_big = jnp.concatenate([k] * HEADS, axis=0) * hsel     # (HEADS*BS, D)
        v_big = jnp.concatenate([v] * HEADS, axis=0) * hsel     # (HEADS*BS, D)
        # scores[n, h*BS + m] = q_h[n] . k_h[m]   (cross-head terms exactly zero via hsel)
        s = jnp.einsum('nd,cd->nc', q, k_big,
                       preferred_element_type=jnp.float32) + attn_bias   # (BS, HEADS*BS)
        s = s - jnp.max(s, axis=-1, keepdims=True)
        p = jnp.exp(s)                 # -1e9 masked / cross-batch terms underflow to 0 (f32)
        # Per-head softmax denominator, replicated across each head's DK lanes, and the
        # unnormalized context; normalization after the matmul is mathematically identical.
        denom = jnp.dot(p, hsel, preferred_element_type=jnp.float32)     # (BS, D)
        ctx = jnp.dot(p, v_big, preferred_element_type=jnp.float32)      # (BS, D)
        ctx = ctx * pl.reciprocal(denom, approx=True)
        # Note: with a causal mask no row is ever fully masked, so denom > 0 always.

        attn = jnp.dot(ctx, w_ref[l, :, W_O:W_O + D],
                       preferred_element_type=jnp.float32) + vec_ref[l, R_BO, :D]
        x = x + attn                   # dropout = identity (eval mode)

        # ---------------- feed-forward sub-layer ----------------------------------------
        z = _center_scale(x)
        h1 = jnp.dot(z, w_ref[l, :, W_1:W_1 + D_FF],
                     preferred_element_type=jnp.float32) + vec_ref[l, R_B1, :D_FF]
        h1 = jnp.maximum(h1, 0.0)      # ReLU
        ff = jnp.dot(h1, w2_ref[l],
                     preferred_element_type=jnp.float32) + vec_ref[l, R_B2, :D]
        x = x + ff

    # Final Norm keeps its own (unfolded) alpha / bias.
    out_ref[...] = lnf_ref[0] * _center_scale(x) + lnf_ref[1]


@jax.jit
def image_feature_decoder(image_tensor, pos_emb, trg_mask, packed):
    # ---- glue done at the call boundary (plain XLA, outside the kernel) ----
    # x already flattened to (BS, D); embedX(operation) * 0 contributes exactly 0.
    x = (image_tensor + pos_emb[None, :, :]).reshape(BS, D).astype(jnp.float32)

    # Block-diagonal additive attention bias over the flattened batch, tiled over heads:
    # 0 where attended, -1e9 where causally masked or cross-batch.
    m = trg_mask.astype(jnp.float32)                                     # (B, S, S)
    mfull = jnp.einsum('bc,bij->bicj',
                       jnp.eye(B, dtype=jnp.float32), m).reshape(BS, BS)
    bias = jnp.where(mfull > 0.5, 0.0, NEG_INF).astype(jnp.float32)      # robust 0/1 test
    attn_bias = jnp.tile(bias, (1, HEADS))                               # (BS, HEADS*BS)

    # Head-selection matrix: hsel[h*BS + m, h'*DK + d] = 1 iff h == h'.  Used to (a) mask
    # the sublane-tiled K/V into block-diagonal form and (b) sum softmax numerators per head.
    row_head = jnp.arange(HEADS * BS, dtype=jnp.int32) // BS
    col_head = jnp.arange(D, dtype=jnp.int32) // DK
    hsel = (row_head[:, None] == col_head[None, :]).astype(jnp.float32)  # (HEADS*BS, D)

    vmem = pl.BlockSpec(memory_space=pltpu.MemorySpace.VMEM)
    inputs = (x, attn_bias, hsel, packed['w_slab'], packed['w2'],
              packed['vec_slab'], packed['lnf'])
    out = pl.pallas_call(
        decoder_kernel,
        out_shape=jax.ShapeDtypeStruct((BS, D), jnp.float32),
        in_specs=[vmem] * len(inputs),
        out_specs=vmem,
    )(*inputs)
    return out.reshape(B, S, D)


def init_params(key):
    ks = jax.random.split(key, 16)

    def init(k, shape, scale=0.05):
        return (scale * jax.random.normal(k, shape)).astype(jnp.float32)

    params = dict(
        # per-layer Norms (alpha=1, bias=0 at init, like torch Norm)
        ln1a=jnp.ones((N_LAYERS, D), jnp.float32),
        ln1b=jnp.zeros((N_LAYERS, D), jnp.float32),
        ln2a=jnp.ones((N_LAYERS, D), jnp.float32),
        ln2b=jnp.zeros((N_LAYERS, D), jnp.float32),
        # attention projections (in_features, out_features): y = x @ W + b
        wq=init(ks[0], (N_LAYERS, D, D)), bq=init(ks[1], (N_LAYERS, D)),
        wk=init(ks[2], (N_LAYERS, D, D)), bk=init(ks[3], (N_LAYERS, D)),
        wv=init(ks[4], (N_LAYERS, D, D)), bv=init(ks[5], (N_LAYERS, D)),
        wo=init(ks[6], (N_LAYERS, D, D)), bo=init(ks[7], (N_LAYERS, D)),
        # feed-forward
        w1=init(ks[8], (N_LAYERS, D, D_FF)), b1=init(ks[9], (N_LAYERS, D_FF)),
        w2=init(ks[10], (N_LAYERS, D_FF, D)), b2=init(ks[11], (N_LAYERS, D)),
        # final Norm
        lnfa=jnp.ones((D,), jnp.float32),
        lnfb=jnp.zeros((D,), jnp.float32),
    )
    # Embedder tables (glue; gathers done outside the kernel)
    pos_table = init(ks[12], (MAX_LEN, D), scale=0.02)     # embedP
    vocab_table = init(ks[13], (VOCAB, D), scale=0.02)     # embedX (unused: * 0 in forward)
    return params, pos_table, vocab_table, ks[14], ks[15]


def pack_params(p):
    """Fold pre-norm LN + 1/sqrt(dk) into the projections and pack 128-lane-aligned slabs.

    Pre-norm: x2 = a*z + b with z = (x-mean)/(std+eps), so
      x2 @ W + bias = z @ (a[:,None] * W) + (b @ W + bias)   -> fold a into W, b into bias.
    """
    inv_sqrt_dk = 1.0 / math.sqrt(DK)
    wq = p['wq'] * p['ln1a'][:, :, None] * inv_sqrt_dk
    wk = p['wk'] * p['ln1a'][:, :, None]
    wv = p['wv'] * p['ln1a'][:, :, None]
    w1 = p['w1'] * p['ln2a'][:, :, None]
    bq = (jnp.einsum('ld,ldj->lj', p['ln1b'], p['wq']) + p['bq']) * inv_sqrt_dk
    bk = jnp.einsum('ld,ldj->lj', p['ln1b'], p['wk']) + p['bk']
    bv = jnp.einsum('ld,ldj->lj', p['ln1b'], p['wv']) + p['bv']
    b1 = jnp.einsum('ld,ldj->lj', p['ln2b'], p['w1']) + p['b1']

    w_slab = jnp.zeros((N_LAYERS, D, W_SLAB_WIDTH), jnp.float32)
    w_slab = w_slab.at[:, :, W_Q:W_Q + D].set(wq)
    w_slab = w_slab.at[:, :, W_K:W_K + D].set(wk)
    w_slab = w_slab.at[:, :, W_V:W_V + D].set(wv)
    w_slab = w_slab.at[:, :, W_O:W_O + D].set(p['wo'])
    w_slab = w_slab.at[:, :, W_1:W_1 + D_FF].set(w1)

    vec_slab = jnp.zeros((N_LAYERS, VEC_ROWS, 128), jnp.float32)
    vec_slab = vec_slab.at[:, R_BQ, :D].set(bq)
    vec_slab = vec_slab.at[:, R_BK, :D].set(bk)
    vec_slab = vec_slab.at[:, R_BV, :D].set(bv)
    vec_slab = vec_slab.at[:, R_BO, :D].set(p['bo'])
    vec_slab = vec_slab.at[:, R_B1, :D_FF].set(b1)
    vec_slab = vec_slab.at[:, R_B2, :D].set(p['b2'])

    lnf = jnp.stack([p['lnfa'], p['lnfb']], axis=0)        # (2, D)
    assert w_slab.shape == (N_LAYERS, D, W_SLAB_WIDTH)
    assert vec_slab.shape == (N_LAYERS, VEC_ROWS, 128)
    return dict(w_slab=w_slab, w2=p['w2'], vec_slab=vec_slab, lnf=lnf)


if __name__ == "__main__":
    key = jax.random.PRNGKey(0)
    params, pos_table, vocab_table, kx, kop = init_params(key)
    packed = pack_params(params)

    # image_tensor: (B, S, D) pre-extracted image features fed to the decoder.
    image_tensor = jax.random.normal(kx, (B, S, D), dtype=jnp.float32)
    # operation tokens: only enter forward as embedX(operation) * 0 == 0.
    operation = jax.random.randint(kop, (B, S), 0, VOCAB)  # noqa: F841 (zeroed term)
    # positions = arange(S); gather positional embeddings in plain JAX (glue).
    pos_emb = pos_table[:S]
    # causal target mask (B, S, S): 1 = attend, 0 = masked.
    trg_mask = jnp.broadcast_to(
        jnp.tril(jnp.ones((S, S), jnp.float32)), (B, S, S))

    out = image_feature_decoder(image_tensor, pos_emb, trg_mask, packed)
    jax.block_until_ready(out)
    assert out.shape == (B, S, D) and out.dtype == jnp.float32
    assert bool(jnp.all(jnp.isfinite(out)))
    print("KERNEL_OK")
</pallas_src>

<mosaic_0001>
module attributes {stable_mosaic.version = 11 : i64} {
  func.func @decoder_kernel(%arg0: memref<16x32xf32, #tpu.memory_space<vmem>>, %arg1: memref<16x64xf32, #tpu.memory_space<vmem>>, %arg2: memref<64x32xf32, #tpu.memory_space<vmem>>, %arg3: memref<2x32x640xf32, #tpu.memory_space<vmem>>, %arg4: memref<2x64x32xf32, #tpu.memory_space<vmem>>, %arg5: memref<2x8x128xf32, #tpu.memory_space<vmem>>, %arg6: memref<2x32xf32, #tpu.memory_space<vmem>>, %arg7: memref<16x32xf32, #tpu.memory_space<vmem>>) attributes {dimension_semantics = [], scalar_prefetch = 0 : i64, scratch_operands = 0 : i64, tpu.core_type = #tpu.core_type<tc>} {
    %c0 = arith.constant 0 : index
    %c0_0 = arith.constant 0 : index
    %0 = vector.load %arg0[%c0, %c0_0] : memref<16x32xf32, #tpu.memory_space<vmem>>, vector<16x32xf32>
    %c0_1 = arith.constant 0 : index
    %c0_2 = arith.constant 0 : index
    %1 = vector.load %arg1[%c0_1, %c0_2] : memref<16x64xf32, #tpu.memory_space<vmem>>, vector<16x64xf32>
    %c0_3 = arith.constant 0 : index
    %c0_4 = arith.constant 0 : index
    %2 = vector.load %arg2[%c0_3, %c0_4] : memref<64x32xf32, #tpu.memory_space<vmem>>, vector<64x32xf32>
    %cst = arith.constant dense<0.000000e+00> : vector<16xf32>
    %3 = vector.multi_reduction <add>, %0, %cst [1] : vector<16x32xf32> to vector<16xf32>
    %4 = vector.shape_cast %3 : vector<16xf32> to vector<16x1xf32>
    %cst_5 = arith.constant 3.125000e-02 : f32
    %5 = vector.broadcast %cst_5 : f32 to vector<16x1xf32>
    %6 = arith.mulf %4, %5 : vector<16x1xf32>
    %7 = vector.broadcast %6 : vector<16x1xf32> to vector<16x32xf32>
    %8 = arith.subf %0, %7 : vector<16x32xf32>
    %9 = arith.mulf %8, %8 : vector<16x32xf32>
    %cst_6 = arith.constant dense<0.000000e+00> : vector<16xf32>
    %10 = vector.multi_reduction <add>, %9, %cst_6 [1] : vector<16x32xf32> to vector<16xf32>
    %11 = vector.shape_cast %10 : vector<16xf32> to vector<16x1xf32>
    %cst_7 = arith.constant 0.0322580636 : f32
    %12 = vector.broadcast %cst_7 : f32 to vector<16x1xf32>
    %13 = arith.mulf %11, %12 : vector<16x1xf32>
    %14 = math.sqrt %13 : vector<16x1xf32>
    %cst_8 = arith.constant 9.99999997E-7 : f32
    %15 = vector.broadcast %cst_8 : f32 to vector<16x1xf32>
    %16 = arith.addf %14, %15 : vector<16x1xf32>
    %17 = tpu.reciprocal %16 : vector<16x1xf32> -> vector<16x1xf32>
    %18 = vector.broadcast %17 : vector<16x1xf32> to vector<16x32xf32>
    %19 = arith.mulf %8, %18 : vector<16x32xf32>
    %c0_9 = arith.constant 0 : index
    %c0_10 = arith.constant 0 : index
    %c0_11 = arith.constant 0 : index
    %20 = vector.load %arg3[%c0_9, %c0_10, %c0_11] : memref<2x32x640xf32, #tpu.memory_space<vmem>>, vector<1x32x384xf32>
    %21 = vector.shape_cast %20 : vector<1x32x384xf32> to vector<32x384xf32>
    %cst_12 = arith.constant dense<0.000000e+00> : vector<16x384xf32>
    %22 = tpu.matmul %19, %21, %cst_12 {dimension_numbers = #tpu.dot_dimension_numbers<[1], [0], [0], [1], [0, 0, 1, 1], [], []>} : vector<16x32xf32>, vector<32x384xf32>, vector<16x384xf32> -> vector<16x384xf32>
    %23 = vector.extract_strided_slice %22 {offsets = [0, 0], sizes = [16, 32], strides = [1, 1]} : vector<16x384xf32> to vector<16x32xf32>
    %c0_13 = arith.constant 0 : index
    %c0_14 = arith.constant 0 : index
    %c0_15 = arith.constant 0 : index
    %24 = vector.load %arg5[%c0_13, %c0_14, %c0_15] : memref<2x8x128xf32, #tpu.memory_space<vmem>>, vector<1x1x32xf32>
    %25 = vector.shape_cast %24 : vector<1x1x32xf32> to vector<32xf32>
    %26 = vector.shape_cast %25 : vector<32xf32> to vector<1x32xf32>
    %27 = vector.broadcast %26 : vector<1x32xf32> to vector<16x32xf32>
    %28 = arith.addf %23, %27 : vector<16x32xf32>
    %29 = vector.extract_strided_slice %22 {offsets = [0, 128], sizes = [16, 32], strides = [1, 1]} : vector<16x384xf32> to vector<16x32xf32>
    %c0_16 = arith.constant 0 : index
    %c1 = arith.constant 1 : index
    %c0_17 = arith.constant 0 : index
    %30 = vector.load %arg5[%c0_16, %c1, %c0_17] : memref<2x8x128xf32, #tpu.memory_space<vmem>>, vector<1x1x32xf32>
    %31 = vector.shape_cast %30 : vector<1x1x32xf32> to vector<32xf32>
    %32 = vector.shape_cast %31 : vector<32xf32> to vector<1x32xf32>
    %33 = vector.broadcast %32 : vector<1x32xf32> to vector<16x32xf32>
    %34 = arith.addf %29, %33 : vector<16x32xf32>
    %35 = vector.extract_strided_slice %22 {offsets = [0, 256], sizes = [16, 32], strides = [1, 1]} : vector<16x384xf32> to vector<16x32xf32>
    %c0_18 = arith.constant 0 : index
    %c2 = arith.constant 2 : index
    %c0_19 = arith.constant 0 : index
    %36 = vector.load %arg5[%c0_18, %c2, %c0_19] : memref<2x8x128xf32, #tpu.memory_space<vmem>>, vector<1x1x32xf32>
    %37 = vector.shape_cast %36 : vector<1x1x32xf32> to vector<32xf32>
    %38 = vector.shape_cast %37 : vector<32xf32> to vector<1x32xf32>
    %39 = vector.broadcast %38 : vector<1x32xf32> to vector<16x32xf32>
    %40 = arith.addf %35, %39 : vector<16x32xf32>
    %41 = tpu.concatenate %34, %34, %34, %34 in 0 : vector<16x32xf32>, vector<16x32xf32>, vector<16x32xf32>, vector<16x32xf32> -> vector<64x32xf32>
    %42 = arith.mulf %41, %2 : vector<64x32xf32>
    %43 = tpu.concatenate %40, %40, %40, %40 in 0 : vector<16x32xf32>, vector<16x32xf32>, vector<16x32xf32>, vector<16x32xf32> -> vector<64x32xf32>
    %44 = arith.mulf %43, %2 : vector<64x32xf32>
    "tpu.trace_start"() <{level = 10 : i32, message = "nd,cd->nc"}> : () -> ()
    %cst_20 = arith.constant dense<0.000000e+00> : vector<16x64xf32>
    %45 = tpu.matmul %28, %42, %cst_20 {dimension_numbers = #tpu.dot_dimension_numbers<[1], [1], [0], [0], [0, 0, 1, 0], [], []>} : vector<16x32xf32>, vector<64x32xf32>, vector<16x64xf32> -> vector<16x64xf32>
    "tpu.trace_stop"() : () -> ()
    %46 = arith.addf %45, %1 : vector<16x64xf32>
    %cst_21 = arith.constant dense<0xFF800000> : vector<16xf32>
    %47 = vector.multi_reduction <maximumf>, %46, %cst_21 [1] : vector<16x64xf32> to vector<16xf32>
    %48 = vector.shape_cast %47 : vector<16xf32> to vector<16x1xf32>
    %49 = vector.broadcast %48 : vector<16x1xf32> to vector<16x64xf32>
    %50 = arith.subf %46, %49 : vector<16x64xf32>
    %51 = math.exp %50 : vector<16x64xf32>
    %cst_22 = arith.constant dense<0.000000e+00> : vector<16x32xf32>
    %52 = tpu.matmul %51, %2, %cst_22 {dimension_numbers = #tpu.dot_dimension_numbers<[1], [0], [0], [1], [0, 0, 1, 1], [], []>} : vector<16x64xf32>, vector<64x32xf32>, vector<16x32xf32> -> vector<16x32xf32>
    %cst_23 = arith.constant dense<0.000000e+00> : vector<16x32xf32>
    %53 = tpu.matmul %51, %44, %cst_23 {dimension_numbers = #tpu.dot_dimension_numbers<[1], [0], [0], [1], [0, 0, 1, 1], [], []>} : vector<16x64xf32>, vector<64x32xf32>, vector<16x32xf32> -> vector<16x32xf32>
    %54 = tpu.reciprocal %52 {approx = true} : vector<16x32xf32> -> vector<16x32xf32>
    %55 = arith.mulf %53, %54 : vector<16x32xf32>
    %c0_24 = arith.constant 0 : index
    %c0_25 = arith.constant 0 : index
    %c384 = arith.constant 384 : index
    %56 = vector.load %arg3[%c0_24, %c0_25, %c384] : memref<2x32x640xf32, #tpu.memory_space<vmem>>, vector<1x32x32xf32>
    %57 = vector.shape_cast %56 : vector<1x32x32xf32> to vector<32x32xf32>
    %cst_26 = arith.constant dense<0.000000e+00> : vector<16x32xf32>
    %58 = tpu.matmul %55, %57, %cst_26 {dimension_numbers = #tpu.dot_dimension_numbers<[1], [0], [0], [1], [0, 0, 1, 1], [], []>} : vector<16x32xf32>, vector<32x32xf32>, vector<16x32xf32> -> vector<16x32xf32>
    %c0_27 = arith.constant 0 : index
    %c3 = arith.constant 3 : index
    %c0_28 = arith.constant 0 : index
    %59 = vector.load %arg5[%c0_27, %c3, %c0_28] : memref<2x8x128xf32, #tpu.memory_space<vmem>>, vector<1x1x32xf32>
    %60 = vector.shape_cast %59 : vector<1x1x32xf32> to vector<32xf32>
    %61 = vector.shape_cast %60 : vector<32xf32> to vector<1x32xf32>
    %62 = vector.broadcast %61 : vector<1x32xf32> to vector<16x32xf32>
    %63 = arith.addf %58, %62 : vector<16x32xf32>
    %64 = arith.addf %0, %63 : vector<16x32xf32>
    %cst_29 = arith.constant dense<0.000000e+00> : vector<16xf32>
    %65 = vector.multi_reduction <add>, %64, %cst_29 [1] : vector<16x32xf32> to vector<16xf32>
    %66 = vector.shape_cast %65 : vector<16xf32> to vector<16x1xf32>
    %cst_30 = arith.constant 3.125000e-02 : f32
    %67 = vector.broadcast %cst_30 : f32 to vector<16x1xf32>
    %68 = arith.mulf %66, %67 : vector<16x1xf32>
    %69 = vector.broadcast %68 : vector<16x1xf32> to vector<16x32xf32>
    %70 = arith.subf %64, %69 : vector<16x32xf32>
    %71 = arith.mulf %70, %70 : vector<16x32xf32>
    %cst_31 = arith.constant dense<0.000000e+00> : vector<16xf32>
    %72 = vector.multi_reduction <add>, %71, %cst_31 [1] : vector<16x32xf32> to vector<16xf32>
    %73 = vector.shape_cast %72 : vector<16xf32> to vector<16x1xf32>
    %cst_32 = arith.constant 0.0322580636 : f32
    %74 = vector.broadcast %cst_32 : f32 to vector<16x1xf32>
    %75 = arith.mulf %73, %74 : vector<16x1xf32>
    %76 = math.sqrt %75 : vector<16x1xf32>
    %cst_33 = arith.constant 9.99999997E-7 : f32
    %77 = vector.broadcast %cst_33 : f32 to vector<16x1xf32>
    %78 = arith.addf %76, %77 : vector<16x1xf32>
    %79 = tpu.reciprocal %78 : vector<16x1xf32> -> vector<16x1xf32>
    %80 = vector.broadcast %79 : vector<16x1xf32> to vector<16x32xf32>
    %81 = arith.mulf %70, %80 : vector<16x32xf32>
    %c0_34 = arith.constant 0 : index
    %c0_35 = arith.constant 0 : index
    %c512 = arith.constant 512 : index
    %82 = vector.load %arg3[%c0_34, %c0_35, %c512] : memref<2x32x640xf32, #tpu.memory_space<vmem>>, vector<1x32x64xf32>
    %83 = vector.shape_cast %82 : vector<1x32x64xf32> to vector<32x64xf32>
    %cst_36 = arith.constant dense<0.000000e+00> : vector<16x64xf32>
    %84 = tpu.matmul %81, %83, %cst_36 {dimension_numbers = #tpu.dot_dimension_numbers<[1], [0], [0], [1], [0, 0, 1, 1], [], []>} : vector<16x32xf32>, vector<32x64xf32>, vector<16x64xf32> -> vector<16x64xf32>
    %c0_37 = arith.constant 0 : index
    %c4 = arith.constant 4 : index
    %c0_38 = arith.constant 0 : index
    %85 = vector.load %arg5[%c0_37, %c4, %c0_38] : memref<2x8x128xf32, #tpu.memory_space<vmem>>, vector<1x1x64xf32>
    %86 = vector.shape_cast %85 : vector<1x1x64xf32> to vector<64xf32>
    %87 = vector.shape_cast %86 : vector<64xf32> to vector<1x64xf32>
    %88 = vector.broadcast %87 : vector<1x64xf32> to vector<16x64xf32>
    %89 = arith.addf %84, %88 : vector<16x64xf32>
    %cst_39 = arith.constant 0.000000e+00 : f32
    %90 = vector.broadcast %cst_39 : f32 to vector<16x64xf32>
    %91 = arith.maximumf %89, %90 : vector<16x64xf32>
    %c0_40 = arith.constant 0 : index
    %c0_41 = arith.constant 0 : index
    %c0_42 = arith.constant 0 : index
    %92 = vector.load %arg4[%c0_40, %c0_41, %c0_42] : memref<2x64x32xf32, #tpu.memory_space<vmem>>, vector<1x64x32xf32>
    %93 = vector.shape_cast %92 : vector<1x64x32xf32> to vector<64x32xf32>
    %cst_43 = arith.constant dense<0.000000e+00> : vector<16x32xf32>
    %94 = tpu.matmul %91, %93, %cst_43 {dimension_numbers = #tpu.dot_dimension_numbers<[1], [0], [0], [1], [0, 0, 1, 1], [], []>} : vector<16x64xf32>, vector<64x32xf32>, vector<16x32xf32> -> vector<16x32xf32>
    %c0_44 = arith.constant 0 : index
    %c5 = arith.constant 5 : index
    %c0_45 = arith.constant 0 : index
    %95 = vector.load %arg5[%c0_44, %c5, %c0_45] : memref<2x8x128xf32, #tpu.memory_space<vmem>>, vector<1x1x32xf32>
    %96 = vector.shape_cast %95 : vector<1x1x32xf32> to vector<32xf32>
    %97 = vector.shape_cast %96 : vector<32xf32> to vector<1x32xf32>
    %98 = vector.broadcast %97 : vector<1x32xf32> to vector<16x32xf32>
    %99 = arith.addf %94, %98 : vector<16x32xf32>
    %100 = arith.addf %64, %99 : vector<16x32xf32>
    %cst_46 = arith.constant dense<0.000000e+00> : vector<16xf32>
    %101 = vector.multi_reduction <add>, %100, %cst_46 [1] : vector<16x32xf32> to vector<16xf32>
    %102 = vector.shape_cast %101 : vector<16xf32> to vector<16x1xf32>
    %cst_47 = arith.constant 3.125000e-02 : f32
    %103 = vector.broadcast %cst_47 : f32 to vector<16x1xf32>
    %104 = arith.mulf %102, %103 : vector<16x1xf32>
    %105 = vector.broadcast %104 : vector<16x1xf32> to vector<16x32xf32>
    %106 = arith.subf %100, %105 : vector<16x32xf32>
    %107 = arith.mulf %106, %106 : vector<16x32xf32>
    %cst_48 = arith.constant dense<0.000000e+00> : vector<16xf32>
    %108 = vector.multi_reduction <add>, %107, %cst_48 [1] : vector<16x32xf32> to vector<16xf32>
    %109 = vector.shape_cast %108 : vector<16xf32> to vector<16x1xf32>
    %cst_49 = arith.constant 0.0322580636 : f32
    %110 = vector.broadcast %cst_49 : f32 to vector<16x1xf32>
    %111 = arith.mulf %109, %110 : vector<16x1xf32>
    %112 = math.sqrt %111 : vector<16x1xf32>
    %cst_50 = arith.constant 9.99999997E-7 : f32
    %113 = vector.broadcast %cst_50 : f32 to vector<16x1xf32>
    %114 = arith.addf %112, %113 : vector<16x1xf32>
    %115 = tpu.reciprocal %114 : vector<16x1xf32> -> vector<16x1xf32>
    %116 = vector.broadcast %115 : vector<16x1xf32> to vector<16x32xf32>
    %117 = arith.mulf %106, %116 : vector<16x32xf32>
    %c1_51 = arith.constant 1 : index
    %c0_52 = arith.constant 0 : index
    %c0_53 = arith.constant 0 : index
    %118 = vector.load %arg3[%c1_51, %c0_52, %c0_53] : memref<2x32x640xf32, #tpu.memory_space<vmem>>, vector<1x32x384xf32>
    %119 = vector.shape_cast %118 : vector<1x32x384xf32> to vector<32x384xf32>
    %cst_54 = arith.constant dense<0.000000e+00> : vector<16x384xf32>
    %120 = tpu.matmul %117, %119, %cst_54 {dimension_numbers = #tpu.dot_dimension_numbers<[1], [0], [0], [1], [0, 0, 1, 1], [], []>} : vector<16x32xf32>, vector<32x384xf32>, vector<16x384xf32> -> vector<16x384xf32>
    %121 = vector.extract_strided_slice %120 {offsets = [0, 0], sizes = [16, 32], strides = [1, 1]} : vector<16x384xf32> to vector<16x32xf32>
    %c1_55 = arith.constant 1 : index
    %c0_56 = arith.constant 0 : index
    %c0_57 = arith.constant 0 : index
    %122 = vector.load %arg5[%c1_55, %c0_56, %c0_57] : memref<2x8x128xf32, #tpu.memory_space<vmem>>, vector<1x1x32xf32>
    %123 = vector.shape_cast %122 : vector<1x1x32xf32> to vector<32xf32>
    %124 = vector.shape_cast %123 : vector<32xf32> to vector<1x32xf32>
    %125 = vector.broadcast %124 : vector<1x32xf32> to vector<16x32xf32>
    %126 = arith.addf %121, %125 : vector<16x32xf32>
    %127 = vector.extract_strided_slice %120 {offsets = [0, 128], sizes = [16, 32], strides = [1, 1]} : vector<16x384xf32> to vector<16x32xf32>
    %c1_58 = arith.constant 1 : index
    %c1_59 = arith.constant 1 : index
    %c0_60 = arith.constant 0 : index
    %128 = vector.load %arg5[%c1_58, %c1_59, %c0_60] : memref<2x8x128xf32, #tpu.memory_space<vmem>>, vector<1x1x32xf32>
    %129 = vector.shape_cast %128 : vector<1x1x32xf32> to vector<32xf32>
    %130 = vector.shape_cast %129 : vector<32xf32> to vector<1x32xf32>
    %131 = vector.broadcast %130 : vector<1x32xf32> to vector<16x32xf32>
    %132 = arith.addf %127, %131 : vector<16x32xf32>
    %133 = vector.extract_strided_slice %120 {offsets = [0, 256], sizes = [16, 32], strides = [1, 1]} : vector<16x384xf32> to vector<16x32xf32>
    %c1_61 = arith.constant 1 : index
    %c2_62 = arith.constant 2 : index
    %c0_63 = arith.constant 0 : index
    %134 = vector.load %arg5[%c1_61, %c2_62, %c0_63] : memref<2x8x128xf32, #tpu.memory_space<vmem>>, vector<1x1x32xf32>
    %135 = vector.shape_cast %134 : vector<1x1x32xf32> to vector<32xf32>
    %136 = vector.shape_cast %135 : vector<32xf32> to vector<1x32xf32>
    %137 = vector.broadcast %136 : vector<1x32xf32> to vector<16x32xf32>
    %138 = arith.addf %133, %137 : vector<16x32xf32>
    %139 = tpu.concatenate %132, %132, %132, %132 in 0 : vector<16x32xf32>, vector<16x32xf32>, vector<16x32xf32>, vector<16x32xf32> -> vector<64x32xf32>
    %140 = arith.mulf %139, %2 : vector<64x32xf32>
    %141 = tpu.concatenate %138, %138, %138, %138 in 0 : vector<16x32xf32>, vector<16x32xf32>, vector<16x32xf32>, vector<16x32xf32> -> vector<64x32xf32>
    %142 = arith.mulf %141, %2 : vector<64x32xf32>
    "tpu.trace_start"() <{level = 10 : i32, message = "nd,cd->nc"}> : () -> ()
    %cst_64 = arith.constant dense<0.000000e+00> : vector<16x64xf32>
    %143 = tpu.matmul %126, %140, %cst_64 {dimension_numbers = #tpu.dot_dimension_numbers<[1], [1], [0], [0], [0, 0, 1, 0], [], []>} : vector<16x32xf32>, vector<64x32xf32>, vector<16x64xf32> -> vector<16x64xf32>
    "tpu.trace_stop"() : () -> ()
    %144 = arith.addf %143, %1 : vector<16x64xf32>
    %cst_65 = arith.constant dense<0xFF800000> : vector<16xf32>
    %145 = vector.multi_reduction <maximumf>, %144, %cst_65 [1] : vector<16x64xf32> to vector<16xf32>
    %146 = vector.shape_cast %145 : vector<16xf32> to vector<16x1xf32>
    %147 = vector.broadcast %146 : vector<16x1xf32> to vector<16x64xf32>
    %148 = arith.subf %144, %147 : vector<16x64xf32>
    %149 = math.exp %148 : vector<16x64xf32>
    %cst_66 = arith.constant dense<0.000000e+00> : vector<16x32xf32>
    %150 = tpu.matmul %149, %2, %cst_66 {dimension_numbers = #tpu.dot_dimension_numbers<[1], [0], [0], [1], [0, 0, 1, 1], [], []>} : vector<16x64xf32>, vector<64x32xf32>, vector<16x32xf32> -> vector<16x32xf32>
    %cst_67 = arith.constant dense<0.000000e+00> : vector<16x32xf32>
    %151 = tpu.matmul %149, %142, %cst_67 {dimension_numbers = #tpu.dot_dimension_numbers<[1], [0], [0], [1], [0, 0, 1, 1], [], []>} : vector<16x64xf32>, vector<64x32xf32>, vector<16x32xf32> -> vector<16x32xf32>
    %152 = tpu.reciprocal %150 {approx = true} : vector<16x32xf32> -> vector<16x32xf32>
    %153 = arith.mulf %151, %152 : vector<16x32xf32>
    %c1_68 = arith.constant 1 : index
    %c0_69 = arith.constant 0 : index
    %c384_70 = arith.constant 384 : index
    %154 = vector.load %arg3[%c1_68, %c0_69, %c384_70] : memref<2x32x640xf32, #tpu.memory_space<vmem>>, vector<1x32x32xf32>
    %155 = vector.shape_cast %154 : vector<1x32x32xf32> to vector<32x32xf32>
    %cst_71 = arith.constant dense<0.000000e+00> : vector<16x32xf32>
    %156 = tpu.matmul %153, %155, %cst_71 {dimension_numbers = #tpu.dot_dimension_numbers<[1], [0], [0], [1], [0, 0, 1, 1], [], []>} : vector<16x32xf32>, vector<32x32xf32>, vector<16x32xf32> -> vector<16x32xf32>
    %c1_72 = arith.constant 1 : index
    %c3_73 = arith.constant 3 : index
    %c0_74 = arith.constant 0 : index
    %157 = vector.load %arg5[%c1_72, %c3_73, %c0_74] : memref<2x8x128xf32, #tpu.memory_space<vmem>>, vector<1x1x32xf32>
    %158 = vector.shape_cast %157 : vector<1x1x32xf32> to vector<32xf32>
    %159 = vector.shape_cast %158 : vector<32xf32> to vector<1x32xf32>
    %160 = vector.broadcast %159 : vector<1x32xf32> to vector<16x32xf32>
    %161 = arith.addf %156, %160 : vector<16x32xf32>
    %162 = arith.addf %100, %161 : vector<16x32xf32>
    %cst_75 = arith.constant dense<0.000000e+00> : vector<16xf32>
    %163 = vector.multi_reduction <add>, %162, %cst_75 [1] : vector<16x32xf32> to vector<16xf32>
    %164 = vector.shape_cast %163 : vector<16xf32> to vector<16x1xf32>
    %cst_76 = arith.constant 3.125000e-02 : f32
    %165 = vector.broadcast %cst_76 : f32 to vector<16x1xf32>
    %166 = arith.mulf %164, %165 : vector<16x1xf32>
    %167 = vector.broadcast %166 : vector<16x1xf32> to vector<16x32xf32>
    %168 = arith.subf %162, %167 : vector<16x32xf32>
    %169 = arith.mulf %168, %168 : vector<16x32xf32>
    %cst_77 = arith.constant dense<0.000000e+00> : vector<16xf32>
    %170 = vector.multi_reduction <add>, %169, %cst_77 [1] : vector<16x32xf32> to vector<16xf32>
    %171 = vector.shape_cast %170 : vector<16xf32> to vector<16x1xf32>
    %cst_78 = arith.constant 0.0322580636 : f32
    %172 = vector.broadcast %cst_78 : f32 to vector<16x1xf32>
    %173 = arith.mulf %171, %172 : vector<16x1xf32>
    %174 = math.sqrt %173 : vector<16x1xf32>
    %cst_79 = arith.constant 9.99999997E-7 : f32
    %175 = vector.broadcast %cst_79 : f32 to vector<16x1xf32>
    %176 = arith.addf %174, %175 : vector<16x1xf32>
    %177 = tpu.reciprocal %176 : vector<16x1xf32> -> vector<16x1xf32>
    %178 = vector.broadcast %177 : vector<16x1xf32> to vector<16x32xf32>
    %179 = arith.mulf %168, %178 : vector<16x32xf32>
    %c1_80 = arith.constant 1 : index
    %c0_81 = arith.constant 0 : index
    %c512_82 = arith.constant 512 : index
    %180 = vector.load %arg3[%c1_80, %c0_81, %c512_82] : memref<2x32x640xf32, #tpu.memory_space<vmem>>, vector<1x32x64xf32>
    %181 = vector.shape_cast %180 : vector<1x32x64xf32> to vector<32x64xf32>
    %cst_83 = arith.constant dense<0.000000e+00> : vector<16x64xf32>
    %182 = tpu.matmul %179, %181, %cst_83 {dimension_numbers = #tpu.dot_dimension_numbers<[1], [0], [0], [1], [0, 0, 1, 1], [], []>} : vector<16x32xf32>, vector<32x64xf32>, vector<16x64xf32> -> vector<16x64xf32>
    %c1_84 = arith.constant 1 : index
    %c4_85 = arith.constant 4 : index
    %c0_86 = arith.constant 0 : index
    %183 = vector.load %arg5[%c1_84, %c4_85, %c0_86] : memref<2x8x128xf32, #tpu.memory_space<vmem>>, vector<1x1x64xf32>
    %184 = vector.shape_cast %183 : vector<1x1x64xf32> to vector<64xf32>
    %185 = vector.shape_cast %184 : vector<64xf32> to vector<1x64xf32>
    %186 = vector.broadcast %185 : vector<1x64xf32> to vector<16x64xf32>
    %187 = arith.addf %182, %186 : vector<16x64xf32>
    %cst_87 = arith.constant 0.000000e+00 : f32
    %188 = vector.broadcast %cst_87 : f32 to vector<16x64xf32>
    %189 = arith.maximumf %187, %188 : vector<16x64xf32>
    %c1_88 = arith.constant 1 : index
    %c0_89 = arith.constant 0 : index
    %c0_90 = arith.constant 0 : index
    %190 = vector.load %arg4[%c1_88, %c0_89, %c0_90] : memref<2x64x32xf32, #tpu.memory_space<vmem>>, vector<1x64x32xf32>
    %191 = vector.shape_cast %190 : vector<1x64x32xf32> to vector<64x32xf32>
    %cst_91 = arith.constant dense<0.000000e+00> : vector<16x32xf32>
    %192 = tpu.matmul %189, %191, %cst_91 {dimension_numbers = #tpu.dot_dimension_numbers<[1], [0], [0], [1], [0, 0, 1, 1], [], []>} : vector<16x64xf32>, vector<64x32xf32>, vector<16x32xf32> -> vector<16x32xf32>
    %c1_92 = arith.constant 1 : index
    %c5_93 = arith.constant 5 : index
    %c0_94 = arith.constant 0 : index
    %193 = vector.load %arg5[%c1_92, %c5_93, %c0_94] : memref<2x8x128xf32, #tpu.memory_space<vmem>>, vector<1x1x32xf32>
    %194 = vector.shape_cast %193 : vector<1x1x32xf32> to vector<32xf32>
    %195 = vector.shape_cast %194 : vector<32xf32> to vector<1x32xf32>
    %196 = vector.broadcast %195 : vector<1x32xf32> to vector<16x32xf32>
    %197 = arith.addf %192, %196 : vector<16x32xf32>
    %198 = arith.addf %162, %197 : vector<16x32xf32>
    %c0_95 = arith.constant 0 : index
    %c0_96 = arith.constant 0 : index
    %199 = vector.load %arg6[%c0_95, %c0_96] : memref<2x32xf32, #tpu.memory_space<vmem>>, vector<1x32xf32>
    %200 = vector.shape_cast %199 : vector<1x32xf32> to vector<32xf32>
    %cst_97 = arith.constant dense<0.000000e+00> : vector<16xf32>
    %201 = vector.multi_reduction <add>, %198, %cst_97 [1] : vector<16x32xf32> to vector<16xf32>
    %202 = vector.shape_cast %201 : vector<16xf32> to vector<16x1xf32>
    %cst_98 = arith.constant 3.125000e-02 : f32
    %203 = vector.broadcast %cst_98 : f32 to vector<16x1xf32>
    %204 = arith.mulf %202, %203 : vector<16x1xf32>
    %205 = vector.broadcast %204 : vector<16x1xf32> to vector<16x32xf32>
    %206 = arith.subf %198, %205 : vector<16x32xf32>
    %207 = arith.mulf %206, %206 : vector<16x32xf32>
    %cst_99 = arith.constant dense<0.000000e+00> : vector<16xf32>
    %208 = vector.multi_reduction <add>, %207, %cst_99 [1] : vector<16x32xf32> to vector<16xf32>
    %209 = vector.shape_cast %208 : vector<16xf32> to vector<16x1xf32>
    %cst_100 = arith.constant 0.0322580636 : f32
    %210 = vector.broadcast %cst_100 : f32 to vector<16x1xf32>
    %211 = arith.mulf %209, %210 : vector<16x1xf32>
    %212 = math.sqrt %211 : vector<16x1xf32>
    %cst_101 = arith.constant 9.99999997E-7 : f32
    %213 = vector.broadcast %cst_101 : f32 to vector<16x1xf32>
    %214 = arith.addf %212, %213 : vector<16x1xf32>
    %215 = tpu.reciprocal %214 : vector<16x1xf32> -> vector<16x1xf32>
    %216 = vector.broadcast %215 : vector<16x1xf32> to vector<16x32xf32>
    %217 = arith.mulf %206, %216 : vector<16x32xf32>
    %218 = vector.shape_cast %200 : vector<32xf32> to vector<1x32xf32>
    %219 = vector.broadcast %218 : vector<1x32xf32> to vector<16x32xf32>
    %220 = arith.mulf %219, %217 : vector<16x32xf32>
    %c1_102 = arith.constant 1 : index
    %c0_103 = arith.constant 0 : index
    %221 = vector.load %arg6[%c1_102, %c0_103] : memref<2x32xf32, #tpu.memory_space<vmem>>, vector<1x32xf32>
    %222 = vector.shape_cast %221 : vector<1x32xf32> to vector<32xf32>
    %223 = vector.shape_cast %222 : vector<32xf32> to vector<1x32xf32>
    %224 = vector.broadcast %223 : vector<1x32xf32> to vector<16x32xf32>
    %225 = arith.addf %220, %224 : vector<16x32xf32>
    %c0_104 = arith.constant 0 : index
    %c0_105 = arith.constant 0 : index
    %226 = vector.load %arg7[%c0_104, %c0_105] : memref<16x32xf32, #tpu.memory_space<vmem>>, vector<16x32xf32>
    tpu.vector_store %arg7[%c0_104, %c0_105], %225 {strides = array<i32>} : memref<16x32xf32, #tpu.memory_space<vmem>>, vector<16x32xf32>,
    return
  }
}

</mosaic_0001>

<bundles_post_ra>
// kernel: tile.9
= control target key start
LH: loop header
LB: loop body
LE: loop exit
PB: predicated region body
PF: predicated region fallthrough
CT: control target
= control target key end

     0   :  { %vm68_vm0 = vcmask 1047556   ;;  %s167_s9 = smov 32   ;;  %s168_s10 = smov 16   ;;  %vm70_vm1 = vcmask 130048   ;;  %vm89_vm2 = vcmask 523648   ;;  %vm110_vm3 = vcmask 392448   ;;  %s259_s0 = inlined_call_operand.vmem [shape: f32[16,4,16], index: 0, kind: input, shape index: {}]   ;;  %s260_s1 = inlined_call_operand.vmem [shape: f32[16,64], index: 1, kind: output, shape index: {}]  }
   0x1   :  { %v152_v0 = vld [vmem:[%s259_s0 + $0x1c] sm:$0xf]  ;;  %v153_v1 = vld [vmem:[%s259_s0 + $0x18] sm:$0xf]  ;;  %v154_v2 = vld [vmem:[%s259_s0 + $0x14] sm:$0xf] }
   0x2   :  { %39 = vst [vmem:[#allocation0 + $0x38] sm:$0xf] %v152_v0  ;;  %v155_v3 = vld [vmem:[%s259_s0 + $0x10] sm:$0xf]  ;;  %v156_v4 = vld [vmem:[%s259_s0 + $0xc] sm:$0xf] }
   0x3   :  { %43 = vst [vmem:[#allocation0 + $0x30] sm:$0xf] %v153_v1  ;;  %v157_v5 = vld [vmem:[%s259_s0 + $0x8] sm:$0xf]  ;;  %v158_v6 = vld [vmem:[%s259_s0 + $0x4] sm:$0xf] }
   0x4   :  { %47 = vst [vmem:[#allocation0 + $0x28] sm:$0xf] %v154_v2  ;;  %v64_v7 = vld [vmem:[%s259_s0] sm:$0xf]  ;;  %v144_v8 = vld [vmem:[%s259_s0 + $0x3c] sm:$0xf] }
   0x5   :  { %51 = vst [vmem:[#allocation0 + $0x20] sm:$0xf] %v155_v3  ;;  %v145_v9 = vld [vmem:[%s259_s0 + $0x38] sm:$0xf]  ;;  %v146_v10 = vld [vmem:[%s259_s0 + $0x34] sm:$0xf] }
   0x6   :  { %55 = vst [vmem:[#allocation0 + $0x18] sm:$0xf] %v156_v4  ;;  %v147_v11 = vld [vmem:[%s259_s0 + $0x30] sm:$0xf]  ;;  %v148_v12 = vld [vmem:[%s259_s0 + $0x2c] sm:$0xf] }
   0x7   :  { %59 = vst [vmem:[#allocation0 + $0x10] sm:$0xf] %v157_v5  ;;  %v149_v13 = vld [vmem:[%s259_s0 + $0x28] sm:$0xf]  ;;  %v150_v15 = vld [vmem:[%s259_s0 + $0x24] sm:$0xf] }
   0x8   :  { %63 = vst [vmem:[#allocation0 + $0x8] sm:$0xf] %v158_v6  ;;  %v151_v17 = vld [vmem:[%s259_s0 + $0x20] sm:$0xf]  ;;  %s166_s0 = smov 48   ;;  %vm131_vm4 = vcmask 261248  }
   0x9   :  { %65 = vst [vmem:[#allocation0] sm:$0xf] %v64_v7 }
   0xa   :  { %7 = vst [vmem:[#allocation0 + $0x78] sm:$0xf] %v144_v8 }
   0xb   :  { %11 = vst [vmem:[#allocation0 + $0x70] sm:$0xf] %v145_v9 }
   0xc   :  { %v84_v14 = vld [vmem:[#allocation0 + $0x3] ss:$8 sm:$0xf0]   ;;  %15 = vst [vmem:[#allocation0 + $0x68] sm:$0xf] %v146_v10 }
   0xd   :  { %v105_v16 = vld [vmem:[#allocation0 + $0x2] ss:$8 sm:$0xf0]   ;;  %19 = vst [vmem:[#allocation0 + $0x60] sm:$0xf] %v147_v11 }
   0xe   :  { %23 = vst [vmem:[#allocation0 + $0x58] sm:$0xf] %v148_v12  ;;  %v126_v18 = vld [vmem:[#allocation0 + $0x1] ss:$8 sm:$0xf0]  }
   0xf   :  { %27 = vst [vmem:[#allocation0 + $0x50] sm:$0xf] %v149_v13  ;;  %v67_v35 = vld [vmem:[#allocation0] ss:$8 sm:$0xf0]  }
  0x10   :  { %v82_v19 = vld [vmem:[#allocation0 + $0x3] ss:$8 sm:$0xf]   ;;  %v103_v20 = vld [vmem:[#allocation0 + $0x2] ss:$8 sm:$0xf]  }
  0x11   :  { %v86_v21 = vsel %vm68_vm0, %v84_v14, %v82_v19  ;;  %v107_v22 = vsel %vm68_vm0, %v105_v16, %v103_v20  ;;  %v124_v23 = vld [vmem:[#allocation0 + $0x1] ss:$8 sm:$0xf]   ;;  %31 = vst [vmem:[#allocation0 + $0x48] sm:$0xf] %v150_v15 }
  0x12   :  { %87 = vrot.lane.b32.xlu0 %v86_v21, %s166_s0  ;;  %108 = vrot.lane.b32.xlu1 %v107_v22, %s167_s9  ;;  %v128_v24 = vsel %vm68_vm0, %v126_v18, %v124_v23  ;;  %35 = vst [vmem:[#allocation0 + $0x40] sm:$0xf] %v151_v17  ;;  %v66_v34 = vld [vmem:[#allocation0] ss:$8 sm:$0xf]  }
  0x13   :  { %129 = vrot.lane.b32.xlu2 %v128_v24, %s168_s10  ;;  %v69_v36 = vsel %vm68_vm0, %v67_v35, %v66_v34 }
  0x14   :  { %v94_v25 = vld [vmem:[#allocation0 + $0x43] ss:$8 sm:$0xf0]   ;;  %v115_v26 = vld [vmem:[#allocation0 + $0x42] ss:$8 sm:$0xf0]  }
  0x15   :  { %v136_v27 = vld [vmem:[#allocation0 + $0x41] ss:$8 sm:$0xf0]   ;;  %71 = vst.msk [vmem:[%s260_s1] sm:$0xff] %vm70_vm1, %v69_v36  }
  0x16   :  { %v75_v38 = vld [vmem:[#allocation0 + $0x40] ss:$8 sm:$0xf0]  }
  0x19   :  { %v92_v28 = vld [vmem:[#allocation0 + $0x43] ss:$8 sm:$0xf]   ;;  %v113_v29 = vld [vmem:[#allocation0 + $0x42] ss:$8 sm:$0xf]  }
  0x1a   :  { %v96_v30 = vsel %vm68_vm0, %v94_v25, %v92_v28  ;;  %v117_v31 = vsel %vm68_vm0, %v115_v26, %v113_v29  ;;  %v134_v32 = vld [vmem:[#allocation0 + $0x41] ss:$8 sm:$0xf]   ;;  %v73_v37 = vld [vmem:[#allocation0 + $0x40] ss:$8 sm:$0xf]  }
  0x1b   :  { %97 = vrot.lane.b32.xlu0 %v96_v30, %s166_s0  ;;  %118 = vrot.lane.b32.xlu1 %v117_v31, %s167_s9  ;;  %v138_v33 = vsel %vm68_vm0, %v136_v27, %v134_v32  ;;  %v77_v40 = vsel %vm68_vm0, %v75_v38, %v73_v37 }
  0x1c   :  { %139 = vrot.lane.b32.xlu2 %v138_v33, %s168_s10  ;;  %159 = vst.msk [vmem:[%s260_s1 + $0x8] sm:$0xff] %vm70_vm1, %v77_v40  }
  0x6d   :  { %v130_v39 = vpop.permute.xlu2 %129  }
  0x76   :  { %v140_v41 = vpop.permute.xlu2 %139  }
  0x84   :  { %v88_v42 = vpop.permute.xlu0 %87   ;;  %v109_v43 = vpop.permute.xlu1 %108  }
  0x85   :  { %90 = vst.msk [vmem:[%s260_s1] sm:$0xff] %vm89_vm2, %v88_v42  }
  0x86   :  { %111 = vst.msk [vmem:[%s260_s1] sm:$0xff] %vm110_vm3, %v109_v43  }
  0x87   :  { %132 = vst.msk [vmem:[%s260_s1] sm:$0xff] %vm131_vm4, %v130_v39  }
  0x8d   :  { %v98_v44 = vpop.permute.xlu0 %97   ;;  %v119_v45 = vpop.permute.xlu1 %118  }
  0x8e   :  { %160 = vst.msk [vmem:[%s260_s1 + $0x8] sm:$0xff] %vm89_vm2, %v98_v44  }
  0x8f   :  { %161 = vst.msk [vmem:[%s260_s1 + $0x8] sm:$0xff] %vm110_vm3, %v119_v45  }
  0x90   :  { %162 = vst.msk [vmem:[%s260_s1 + $0x8] sm:$0xff] %vm131_vm4, %v140_v41  }

// kernel: image_feature_decoder.1
= control target key start
LH: loop header
LB: loop body
LE: loop exit
PB: predicated region body
PF: predicated region fallthrough
CT: control target
= control target key end

     0   :  { %12 = vsyncpa [#allocation3], 0  ;;  %s1778_s0 = inlined_call_operand.vmem [shape: f32[16,32], index: 0, kind: input, shape index: {}]   ;;  %s1779_s1 = inlined_call_operand.vmem [shape: f32[16,64], index: 1, kind: input, shape index: {}]   ;;  %s1780_s2 = inlined_call_operand.vmem [shape: f32[64,32], index: 2, kind: input, shape index: {}]   ;;  %s1781_s3 = inlined_call_operand.hbm [shape: f32[2,32,640], index: 3, kind: input, shape index: {}]   ;;  %s1782_s4 = inlined_call_operand.vmem [shape: f32[2,64,32], index: 4, kind: input, shape index: {}]   ;;  %s1783_s5 = inlined_call_operand.vmem [shape: f32[2,8,128], index: 5, kind: input, shape index: {}]   ;;  %s1784_s6 = inlined_call_operand.vmem [shape: f32[2,32], index: 6, kind: input, shape index: {}]   ;;  %s1785_s7 = inlined_call_operand.hbm [shape: f32[16,32], index: 7, kind: output, shape index: {}]  }
   0x1   :  { %13 = vsyncpa [#allocation4], 0  ;;  %s24_s26 = sshll.u32 %s1781_s3, 4  ;;  %s1365_s27 = smov [#allocation2]   ;;  %s25_s26 = int_to_ptr.hbm [resolvable:$true] %s24_s26 }
   0x2   :  { %s26_s28 = sshll.u32 %s1365_s27, 4  ;;  %s1366_s29 = smov 640   ;;  %s27_s28 = int_to_ptr.vmem [resolvable:$true] %s26_s28 }
   0x3   :  { %s1367_s30 = smov 40  }
   0x4   :  { %32 = dma.hbm_to_vmem [thread:$0]  %s25_s26, 5120, %s27_s28, [#allocation3], %s1366_s29, %s1366_s29, %s1367_s30  }
   0x5   :  { %1361 = dma.done.wait [#allocation3], 5120  }
   0x6   :  { %1362 = vsyncadd [#allocation3], 4294962176  ;;  %vm55_vm0 = vcmask 261120   ;;  %v1417_v0 = vld [vmem:[%s1778_s0] sm:$0xff]  ;;  %v1424_v2 = vld [vmem:[%s1778_s0 + $0x8] sm:$0xff]  ;;  %vm300_vm13 = vcmask 523264  }
   0x7   :  { %v56_v1 = vsel %vm55_vm0, %v1417_v0, 0.0  ;;  %v59_v3 = vsel %vm55_vm0, %v1424_v2, 0.0  ;;  %v141_v14 = vld [vmem:[#allocation2 + $0x78] sm:$0xff]  ;;  %v142_v15 = vld [vmem:[#allocation2 + $0x80] sm:$0xff]  ;;  %v143_v16 = vld [vmem:[#allocation2 + $0x88] sm:$0xff]  ;;  %s1368_s3 = smov [#allocation5]  }
   0x8   :  { %57 = vadd.xlane.f32.xlu0 %v56_v1  ;;  %162 = vmatpush.msra.mxu0 %v141_v14  ;;  %v138_v17 = vld [vmem:[#allocation2 + $0x50] sm:$0xff]  ;;  %v139_v18 = vld [vmem:[#allocation2 + $0x58] sm:$0xff]  ;;  %v140_v19 = vld [vmem:[#allocation2 + $0x60] sm:$0xff]  ;;  %s1156_s10 = sshll.u32 %s1368_s3, 4  ;;  %s1158_s0 = sshll.u32 %s1785_s7, 4  ;;  %s1157_s10 = int_to_ptr.vmem [resolvable:$true] %s1156_s10  ;;  %s1159_s0 = int_to_ptr.hbm [resolvable:$true] %s1158_s0 }
   0x9   :  { %185 = vmatpush.msra.mxu1 %v142_v15  ;;  %208 = vmatpush.msra.mxu2 %v143_v16  ;;  %v135_v20 = vld [vmem:[#allocation2 + $0x28] sm:$0xff]  ;;  %v136_v21 = vld [vmem:[#allocation2 + $0x30] sm:$0xff]  ;;  %v137_v22 = vld [vmem:[#allocation2 + $0x38] sm:$0xff]  ;;  %s1369_s11 = smov 128   ;;  %s1370_s12 = smov 8  }
   0xa   :  { %163 = vmatpush.msra.mxu0 %v138_v17  ;;  %v132_v24 = vld [vmem:[#allocation2] sm:$0xff]  ;;  %v133_v25 = vld [vmem:[#allocation2 + $0x8] sm:$0xff]  ;;  %v134_v27 = vld [vmem:[#allocation2 + $0x10] sm:$0xff] }
   0xb   :  { %186 = vmatpush.msra.mxu1 %v139_v18  ;;  %209 = vmatpush.msra.mxu2 %v140_v19  ;;  %v1457_v14 = vld [vmem:[%s1780_s2 + $0x30] sm:$0xff]  ;;  %v1469_v15 = vld [vmem:[%s1780_s2 + $0x20] sm:$0xff]  ;;  %v1475_v16 = vld [vmem:[%s1780_s2 + $0x18] sm:$0xff] }
   0xc   :  { %164 = vmatpush.msra.mxu0 %v135_v20  ;;  %v1481_v17 = vld [vmem:[%s1780_s2 + $0x10] sm:$0xff]  ;;  %v1487_v18 = vld [vmem:[%s1780_s2 + $0x8] sm:$0xff]  ;;  %v1493_v19 = vld [vmem:[%s1780_s2] sm:$0xff] }
   0xd   :  { %187 = vmatpush.msra.mxu1 %v136_v21  ;;  %210 = vmatpush.msra.mxu2 %v137_v22  ;;  %v1244_v21 = vld [vmem:[%s1783_s5 + $0x1] ss:$0 sm:$0xff] }
   0xe   :  { %165 = vmatpush.msra.mxu0 %v132_v24 }
   0xf   :  { %188 = vmatpush.msra.mxu1 %v133_v25  ;;  %211 = vmatpush.msra.mxu2 %v134_v27  ;;  %v1245_v27 = vld [vmem:[%s1783_s5 + $0x2] ss:$0 sm:$0xff] }
  0x10   :  { %60 = vadd.xlane.f32.xlu0 %v59_v3 }
  0x7b   :  { %v58_v4 = vpop.xlane.xlu0 %57 }
  0x7c   :  { %v62_v5 = vmul.f32 0.03125, %v58_v4 }
  0x7e   :  { %v1429_v6 = vsub.f32 %v1417_v0, %v62_v5 }
  0x80   :  { %v66_v7 = vmul.f32 %v1429_v6, %v1429_v6 }
  0x82   :  { %v68_v8 = vsel %vm55_vm0, %v66_v7, 0.0 }
  0x83   :  { %69 = vadd.xlane.f32.xlu1 %v68_v8  ;;  %v61_v9 = vpop.xlane.xlu0 %60 }
  0x84   :  { %v63_v10 = vmul.f32 0.03125, %v61_v9 }
  0x86   :  { %v1435_v11 = vsub.f32 %v1424_v2, %v63_v10 }
  0x88   :  { %v67_v12 = vmul.f32 %v1435_v11, %v1435_v11 }
  0x8a   :  { %v71_v13 = vsel %vm55_vm0, %v67_v12, 0.0 }
  0x8b   :  { %72 = vadd.xlane.f32.xlu1 %v71_v13  ;;  %v1451_v13 = vld [vmem:[%s1780_s2 + $0x38] sm:$0xff] }
  0x8c   :  { %327 = vmatpush.msrb.mxu0 %v1451_v13 }
  0x8e   :  { %328 = vmatpush.msrb.mxu0 %v1457_v14 }
  0xf6   :  { %v70_v23 = vpop.xlane.xlu1 %69 }
  0xf7   :  { %v74_v26 = vmul.f32 0.032258064, %v70_v23 }
  0xf9   :  { %1257 = vrsqrt.f32 %v74_v26  ;;  %vm83_vm1 = vcmp.eq.f32.partialorder %v74_v26, inf  ;;  %v86_v40 = vand.u32 2147483648, %v74_v26  ;;  %vm85_vm2 = vcmp.eq.f32.partialorder %v74_v26, 0.0 }
  0xfe   :  { %v73_v28 = vpop.xlane.xlu1 %72 }
  0xff   :  { %v1258_v29 = vpop.eup %1257  ;;  %v75_v30 = vmul.f32 0.032258064, %v73_v28 }
 0x100   :  { %v77_v31 = vmul.f32 %v1258_v29, %v74_v26 }
 0x101   :  { %1259 = vrsqrt.f32 %v75_v30  ;;  %vm95_vm3 = vcmp.eq.f32.partialorder %v75_v30, inf  ;;  %v98_v48 = vand.u32 2147483648, %v75_v30  ;;  %vm97_vm4 = vcmp.eq.f32.partialorder %v75_v30, 0.0 }
 0x102   :  { %v78_v32 = vmul.f32 %v1258_v29, %v77_v31 }
 0x104   :  { %v79_v33 = vmul.f32 0.5, %v78_v32 }
 0x106   :  { %v80_v34 = vsub.f32 1.5, %v79_v33 }
 0x107   :  { %v1260_v35 = vpop.eup %1259 }
 0x108   :  { %v81_v36 = vmul.f32 %v1258_v29, %v80_v34  ;;  %v89_v37 = vmul.f32 %v1260_v35, %v75_v30 }
 0x10a   :  { %v82_v38 = vmul.f32 %v81_v36, %v74_v26  ;;  %v90_v39 = vmul.f32 %v1260_v35, %v89_v37 }
 0x10c   :  { %v91_v41 = vmul.f32 0.5, %v90_v39  ;;  %v84_v42 = vsel %vm83_vm1, %v74_v26, %v82_v38 }
 0x10d   :  { %v87_v43 = vsel %vm85_vm2, %v86_v40, %v84_v42 }
 0x10e   :  { %v92_v44 = vsub.f32 1.5, %v91_v41  ;;  %v100_v45 = vadd.f32 1e-06, %v87_v43 }
 0x110   :  { %v93_v46 = vmul.f32 %v1260_v35, %v92_v44  ;;  %1261 = vrcp.f32 %v100_v45  ;;  %v113_v55 = vand.u32 2147483648, %v100_v45  ;;  %v111_v57 = vand.u32 2147483647, %v100_v45 }
 0x111   :  { %vm107_vm6 = vweird.f32 %v100_v45 }
 0x112   :  { %v94_v47 = vmul.f32 %v93_v46, %v75_v30  ;;  %v114_v60 = vor.u32 1.1754944e-38, %v113_v55  ;;  %vm112_vm8 = vcmp.eq.f32.partialorder %v111_v57, 8.507059e+37  ;;  %v1243_v46 = vld [vmem:[%s1783_s5] ss:$0 sm:$0xff]  ;;  %v1541_v55 = vld [vmem:[%s1779_s1 + $0x8] sm:$0xff] }
 0x114   :  { %v96_v49 = vsel %vm95_vm3, %v75_v30, %v94_v47 }
 0x115   :  { %v99_v50 = vsel %vm97_vm4, %v98_v48, %v96_v49 }
 0x116   :  { %v1262_v51 = vpop.eup %1261  ;;  %v101_v52 = vadd.f32 1e-06, %v99_v50 }
 0x117   :  { %v103_v53 = vmul.f32 %v1262_v51, %v100_v45  ;;  %vm108_vm5 = vweird.f32 %v1262_v51 }
 0x118   :  { %1263 = vrcp.f32 %v101_v52  ;;  %vm109_vm7 = vmor %vm107_vm6, %vm108_vm5  ;;  %v127_v4 = vand.u32 2147483648, %v101_v52  ;;  %v125_v7 = vand.u32 2147483647, %v101_v52  ;;  %vm121_vm10 = vweird.f32 %v101_v52 }
 0x119   :  { %v104_v54 = vsub.f32 1.0, %v103_v53 }
 0x11a   :  { %v128_v9 = vor.u32 1.1754944e-38, %v127_v4  ;;  %vm126_vm12 = vcmp.eq.f32.partialorder %v125_v7, 8.507059e+37 }
 0x11b   :  { %v105_v56 = vmul.f32 %v1262_v51, %v104_v54 }
 0x11d   :  { %v106_v58 = vadd.f32 %v1262_v51, %v105_v56 }
 0x11e   :  { %v1264_v59 = vpop.eup %1263 }
 0x11f   :  { %v110_v61 = vsel %vm109_vm7, %v1262_v51, %v106_v58  ;;  %v117_v62 = vmul.f32 %v1264_v59, %v101_v52  ;;  %vm122_vm9 = vweird.f32 %v1264_v59  ;;  %v1534_v51 = vld [vmem:[%s1779_s1] sm:$0xff] }
 0x120   :  { %v115_v63 = vsel %vm112_vm8, %v114_v60, %v110_v61  ;;  %vm123_vm11 = vmor %vm121_vm10, %vm122_vm9  ;;  %v371_v60 = vld [vmem:[#allocation2 + $0x68] sm:$0xff] }
 0x121   :  { %v130_v1 = vmul.f32 %v115_v63, %v1429_v6  ;;  %v118_v3 = vsub.f32 1.0, %v117_v62 }
 0x123   :  { %1171 = vmatmul.msk.f32.vlgmr.msra.gmra.mxu0 %vm55_vm0, %v130_v1  ;;  %1173 = vmatmul.msk.f32.vlgmr.msra.gmra.mxu1 %vm55_vm0, %v130_v1  ;;  %v119_v5 = vmul.f32 %v1264_v59, %v118_v3 }
 0x124   :  { %1175 = vmatmul.msk.f32.vlgmr.msra.gmra.mxu2 %vm55_vm0, %v130_v1 }
 0x125   :  { %v120_v8 = vadd.f32 %v1264_v59, %v119_v5 }
 0x127   :  { %v124_v10 = vsel %vm123_vm11, %v1264_v59, %v120_v8  ;;  %v372_v59 = vld [vmem:[#allocation2 + $0x90] sm:$0xff]  ;;  %v370_v8 = vld [vmem:[#allocation2 + $0x40] sm:$0xff] }
 0x128   :  { %v129_v12 = vsel %vm126_vm12, %v128_v9, %v124_v10  ;;  %393 = vmatpush.msrb.mxu2 %v372_v59  ;;  %v369_v9 = vld [vmem:[#allocation2 + $0x18] sm:$0xff] }
 0x129   :  { %v131_v6 = vmul.f32 %v129_v12, %v1435_v11  ;;  %v1463_v11 = vld [vmem:[%s1780_s2 + $0x28] sm:$0xff] }
 0x12a   :  { %329 = vmatpush.msrb.mxu0 %v1463_v11  ;;  %394 = vmatpush.msrb.mxu2 %v371_v60 }
 0x12b   :  { %1172 = vmatmul.msk.f32.gmra.mxu0 %vm55_vm0, %v131_v6  ;;  %1174 = vmatmul.msk.f32.gmra.mxu1 %vm55_vm0, %v131_v6 }
 0x12c   :  { %1176 = vmatmul.msk.f32.gmra.mxu2 %vm55_vm0, %v131_v6  ;;  %330 = vmatpush.msrb.mxu0 %v1469_v15 }
 0x12d   :  { %395 = vmatpush.msrb.mxu2 %v370_v8 }
 0x12e   :  { %331 = vmatpush.msrb.mxu0 %v1475_v16 }
 0x12f   :  { %396 = vmatpush.msrb.mxu2 %v369_v9 }
 0x130   :  { %332 = vmatpush.msrb.mxu0 %v1481_v17 }
 0x132   :  { %333 = vmatpush.msrb.mxu0 %v1487_v18 }
 0x134   :  { %334 = vmatpush.msrb.mxu0 %v1493_v19 }
 0x1a0   :  { %v190_v20 = vpop.f32.mrf.mxu1  ;;  %v167_v45 = vpop.f32.mrf.mxu0 }
 0x1a1   :  { %v225_v25 = vadd.f32 %v1244_v21, %v190_v20  ;;  %v221_v48 = vadd.f32 %v1243_v46, %v167_v45 }
 0x1a3   :  { %v237_v29 = vmul.f32 %v225_v25, %v1457_v14  ;;  %v235_v36 = vmul.f32 %v225_v25, %v1469_v15  ;;  %v233_v42 = vmul.f32 %v225_v25, %v1481_v17  ;;  %v231_v47 = vmul.f32 %v225_v25, %v1493_v19  ;;  %v1246_v25 = vld [vmem:[%s1783_s5 + $0x3] ss:$0 sm:$0xff] }
 0x1a7   :  { %v213_v22 = vpop.f32.mrf.mxu2 }
 0x1a8   :  { %v193_v23 = vpop.f32.mrf.mxu1  ;;  %v229_v30 = vadd.f32 %v1245_v27, %v213_v22  ;;  %v170_v49 = vpop.f32.mrf.mxu0 }
 0x1a9   :  { %v226_v24 = vadd.f32 %v1244_v21, %v193_v23  ;;  %v222_v50 = vadd.f32 %v1243_v46, %v170_v49  ;;  %v482_v46 = vld [vmem:[#allocation2 + $0x20] sm:$0xff] }
 0x1aa   :  { %v245_v34 = vmul.f32 %v229_v30, %v1457_v14  ;;  %v243_v37 = vmul.f32 %v229_v30, %v1469_v15  ;;  %v241_v40 = vmul.f32 %v229_v30, %v1481_v17  ;;  %v239_v43 = vmul.f32 %v229_v30, %v1493_v19 }
 0x1ab   :  { %v238_v26 = vmul.f32 %v226_v24, %v1451_v13  ;;  %v236_v33 = vmul.f32 %v226_v24, %v1463_v11  ;;  %v234_v39 = vmul.f32 %v226_v24, %v1475_v16  ;;  %v232_v44 = vmul.f32 %v226_v24, %v1487_v18 }
 0x1ad   :  { %1177 = vmatpush.xpose.msk.msra.mxu3 %vm55_vm0, %v238_v26 }
 0x1af   :  { %v216_v28 = vpop.f32.mrf.mxu2 }
 0x1b0   :  { %v230_v31 = vadd.f32 %v1245_v27, %v216_v28 }
 0x1b1   :  { %1178 = vmatpush.xpose.msk.msra.mxu3 %vm55_vm0, %v237_v29 }
 0x1b2   :  { %v246_v32 = vmul.f32 %v230_v31, %v1451_v13  ;;  %v244_v35 = vmul.f32 %v230_v31, %v1463_v11  ;;  %v242_v38 = vmul.f32 %v230_v31, %v1475_v16  ;;  %v240_v41 = vmul.f32 %v230_v31, %v1487_v18 }
 0x1b4   :  { %350 = vmatpush.msrb.mxu1 %v246_v32 }
 0x1b5   :  { %1179 = vmatpush.xpose.msk.msra.mxu3 %vm55_vm0, %v236_v33 }
 0x1b6   :  { %351 = vmatpush.msrb.mxu1 %v245_v34 }
 0x1b8   :  { %352 = vmatpush.msrb.mxu1 %v244_v35 }
 0x1b9   :  { %1180 = vmatpush.xpose.msk.msra.mxu3 %vm55_vm0, %v235_v36 }
 0x1ba   :  { %353 = vmatpush.msrb.mxu1 %v243_v37 }
 0x1bc   :  { %354 = vmatpush.msrb.mxu1 %v242_v38 }
 0x1bd   :  { %1181 = vmatpush.xpose.msk.msra.mxu3 %vm55_vm0, %v234_v39 }
 0x1be   :  { %355 = vmatpush.msrb.mxu1 %v241_v40 }
 0x1c0   :  { %356 = vmatpush.msrb.mxu1 %v240_v41 }
 0x1c1   :  { %1182 = vmatpush.xpose.msk.msra.mxu3 %vm55_vm0, %v233_v42  ;;  %v485_v42 = vld [vmem:[#allocation2 + $0x98] sm:$0xff] }
 0x1c2   :  { %357 = vmatpush.msrb.mxu1 %v239_v43  ;;  %v484_v43 = vld [vmem:[#allocation2 + $0x70] sm:$0xff]  ;;  %506 = vmatpush.msra.mxu0 %v485_v42 }
 0x1c4   :  { %507 = vmatpush.msra.mxu0 %v484_v43 }
 0x1c5   :  { %1183 = vmatpush.xpose.msk.msra.mxu3 %vm55_vm0, %v232_v44  ;;  %v483_v44 = vld [vmem:[#allocation2 + $0x48] sm:$0xff] }
 0x1c6   :  { %508 = vmatpush.msra.mxu0 %v483_v44 }
 0x1c8   :  { %509 = vmatpush.msra.mxu0 %v482_v46 }
 0x1c9   :  { %1184 = vmatpush.xpose.msk.msra.mxu3 %vm55_vm0, %v231_v47 }
 0x1cc   :  { %1185 = vmatmul.msk.f32.vlgmr.msra.gmra.mxu3 %vm55_vm0, %v221_v48 }
 0x1d4   :  { %1186 = vmatmul.msk.f32.gmra.mxu3 %vm55_vm0, %v222_v50 }
 0x24f   :  { %v294_v52 = vpop.f32.mrf.mxu3 }
 0x250   :  { %v295_v53 = vadd.f32 %v294_v52, %v1534_v51 }
 0x252   :  { %v301_v54 = vsel %vm300_vm13, %v295_v53, -inf }
 0x253   :  { %302 = vmax.xlane.f32.xlu2 %v301_v54 }
 0x257   :  { %v297_v56 = vpop.f32.mrf.mxu3 }
 0x258   :  { %v298_v57 = vadd.f32 %v297_v56, %v1541_v55 }
 0x25a   :  { %v304_v58 = vsel %vm300_vm13, %v298_v57, -inf }
 0x25b   :  { %305 = vmax.xlane.f32.xlu2 %v304_v58 }
 0x2c6   :  { %v303_v61 = vpop.xlane.xlu2 %302 }
 0x2c7   :  { %v307_v62 = vsub.f32 %v295_v53, %v303_v61 }
 0x2c9   :  { %v309_v63 = vmul.f32 1.442695, %v307_v62 }
 0x2cb   :  { %1265 = vpow2.f32 %v309_v63  ;;  %v526_v63 = vld [vmem:[%s1782_s4 + $0x38] sm:$0xff] }
 0x2cc   :  { %543 = vmatpush.msra.mxu1 %v526_v63 }
 0x2ce   :  { %v306_v1 = vpop.xlane.xlu2 %305 }
 0x2cf   :  { %v308_v3 = vsub.f32 %v298_v57, %v306_v1  ;;  %v525_v1 = vld [vmem:[%s1782_s4 + $0x30] sm:$0xff] }
 0x2d0   :  { %544 = vmatpush.msra.mxu1 %v525_v1 }
 0x2d1   :  { %v1266_v4 = vpop.eup %1265  ;;  %v311_v5 = vmul.f32 1.442695, %v308_v3 }
 0x2d2   :  { %1187 = vmatmul.msk.f32.vlgmr.msrb.gmra.mxu0 %vm300_vm13, %v1266_v4  ;;  %1189 = vmatmul.msk.f32.vlgmr.msrb.gmra.mxu1 %vm300_vm13, %v1266_v4 }
 0x2d3   :  { %1267 = vpow2.f32 %v311_v5 }
 0x2d9   :  { %v1268_v7 = vpop.eup %1267 }
 0x2da   :  { %1188 = vmatmul.msk.f32.gmra.mxu0 %vm300_vm13, %v1268_v7  ;;  %1190 = vmatmul.msk.f32.gmra.mxu1 %vm300_vm13, %v1268_v7  ;;  %v524_v7 = vld [vmem:[%s1782_s4 + $0x28] sm:$0xff] }
 0x2db   :  { %545 = vmatpush.msra.mxu1 %v524_v7 }
 0x34f   :  { %v336_v10 = vpop.f32.mrf.mxu0  ;;  %v359_v12 = vpop.f32.mrf.mxu1 }
 0x350   :  { %1269 = vrcp.f32 %v336_v10  ;;  %v523_v10 = vld [vmem:[%s1782_s4 + $0x20] sm:$0xff] }
 0x351   :  { %546 = vmatpush.msra.mxu1 %v523_v10 }
 0x356   :  { %v1270_v6 = vpop.eup %1269 }
 0x357   :  { %v367_v20 = vmul.f32 %v1270_v6, %v359_v12  ;;  %v339_v21 = vpop.f32.mrf.mxu0  ;;  %v362_v23 = vpop.f32.mrf.mxu1  ;;  %v522_v6 = vld [vmem:[%s1782_s4 + $0x18] sm:$0xff] }
 0x358   :  { %1271 = vrcp.f32 %v339_v21  ;;  %547 = vmatpush.msra.mxu1 %v522_v6 }
 0x359   :  { %1191 = vmatmul.msk.f32.vlgmr.msrb.gmra.mxu2 %vm55_vm0, %v367_v20 }
 0x35e   :  { %v1272_v22 = vpop.eup %1271 }
 0x35f   :  { %v368_v24 = vmul.f32 %v1272_v22, %v362_v23  ;;  %v521_v22 = vld [vmem:[%s1782_s4 + $0x10] sm:$0xff] }
 0x360   :  { %548 = vmatpush.msra.mxu1 %v521_v22  ;;  %v647_v22 = vld [vmem:[#allocation2 + $0x120] sm:$0xff] }
 0x361   :  { %1192 = vmatmul.msk.f32.gmra.mxu2 %vm55_vm0, %v368_v24  ;;  %690 = vmatpush.msrb.mxu3 %v647_v22 }
 0x3dc   :  { %v398_v26 = vpop.f32.mrf.mxu2 }
 0x3dd   :  { %v399_v27 = vadd.f32 %v1246_v25, %v398_v26 }
 0x3df   :  { %v1555_v28 = vadd.f32 %v399_v27, %v1417_v0 }
 0x3e1   :  { %v406_v29 = vsel %vm55_vm0, %v1555_v28, 0.0 }
 0x3e2   :  { %407 = vadd.xlane.f32.xlu0 %v406_v29 }
 0x3e4   :  { %v401_v30 = vpop.f32.mrf.mxu2 }
 0x3e5   :  { %v402_v31 = vadd.f32 %v1246_v25, %v401_v30 }
 0x3e7   :  { %v1560_v32 = vadd.f32 %v402_v31, %v1424_v2 }
 0x3e9   :  { %v409_v33 = vsel %vm55_vm0, %v1560_v32, 0.0 }
 0x3ea   :  { %410 = vadd.xlane.f32.xlu1 %v409_v33 }
 0x455   :  { %v408_v34 = vpop.xlane.xlu0 %407 }
 0x456   :  { %v412_v35 = vmul.f32 0.03125, %v408_v34 }
 0x458   :  { %v1565_v36 = vsub.f32 %v1555_v28, %v412_v35 }
 0x45a   :  { %v416_v0 = vmul.f32 %v1565_v36, %v1565_v36 }
 0x45c   :  { %v418_v37 = vsel %vm55_vm0, %v416_v0, 0.0 }
 0x45d   :  { %419 = vadd.xlane.f32.xlu2 %v418_v37  ;;  %v411_v38 = vpop.xlane.xlu1 %410 }
 0x45e   :  { %v413_v39 = vmul.f32 0.03125, %v411_v38 }
 0x460   :  { %v1571_v2 = vsub.f32 %v1560_v32, %v413_v39 }
 0x462   :  { %v417_v40 = vmul.f32 %v1571_v2, %v1571_v2 }
 0x464   :  { %v421_v41 = vsel %vm55_vm0, %v417_v40, 0.0 }
 0x465   :  { %422 = vadd.xlane.f32.xlu0 %v421_v41 }
 0x4d0   :  { %v420_v45 = vpop.xlane.xlu2 %419 }
 0x4d1   :  { %v424_v47 = vmul.f32 0.032258064, %v420_v45 }
 0x4d3   :  { %1273 = vrsqrt.f32 %v424_v47  ;;  %vm433_vm14 = vcmp.eq.f32.partialorder %v424_v47, inf  ;;  %v436_v62 = vand.u32 2147483648, %v424_v47  ;;  %vm435_vm15 = vcmp.eq.f32.partialorder %v424_v47, 0.0 }
 0x4d8   :  { %v423_v48 = vpop.xlane.xlu0 %422 }
 0x4d9   :  { %v1274_v49 = vpop.eup %1273  ;;  %v425_v50 = vmul.f32 0.032258064, %v423_v48 }
 0x4da   :  { %v427_v52 = vmul.f32 %v1274_v49, %v424_v47 }
 0x4db   :  { %1275 = vrsqrt.f32 %v425_v50  ;;  %vm445_vm1 = vcmp.eq.f32.partialorder %v425_v50, inf  ;;  %v448_v21 = vand.u32 2147483648, %v425_v50  ;;  %vm447_vm2 = vcmp.eq.f32.partialorder %v425_v50, 0.0 }
 0x4dc   :  { %v428_v53 = vmul.f32 %v1274_v49, %v427_v52  ;;  %v1247_v52 = vld [vmem:[%s1783_s5 + $0x4] ss:$0 sm:$0xff] }
 0x4de   :  { %v429_v54 = vmul.f32 0.5, %v428_v53 }
 0x4e0   :  { %v430_v56 = vsub.f32 1.5, %v429_v54 }
 0x4e1   :  { %v1276_v57 = vpop.eup %1275 }
 0x4e2   :  { %v431_v58 = vmul.f32 %v1274_v49, %v430_v56  ;;  %v439_v59 = vmul.f32 %v1276_v57, %v425_v50 }
 0x4e4   :  { %v432_v60 = vmul.f32 %v431_v58, %v424_v47  ;;  %v440_v61 = vmul.f32 %v1276_v57, %v439_v59  ;;  %v1248_v59 = vld [vmem:[%s1783_s5 + $0x5] ss:$0 sm:$0xff] }
 0x4e6   :  { %v434_v3 = vsel %vm433_vm14, %v424_v47, %v432_v60  ;;  %v441_v4 = vmul.f32 0.5, %v440_v61 }
 0x4e7   :  { %v437_v5 = vsel %vm435_vm15, %v436_v62, %v434_v3 }
 0x4e8   :  { %v450_v8 = vadd.f32 1e-06, %v437_v5  ;;  %v442_v9 = vsub.f32 1.5, %v441_v4 }
 0x4ea   :  { %1277 = vrcp.f32 %v450_v8  ;;  %v443_v12 = vmul.f32 %v1276_v57, %v442_v9  ;;  %v463_v30 = vand.u32 2147483648, %v450_v8  ;;  %v461_v33 = vand.u32 2147483647, %v450_v8 }
 0x4eb   :  { %vm457_vm4 = vweird.f32 %v450_v8 }
 0x4ec   :  { %v444_v20 = vmul.f32 %v443_v12, %v425_v50  ;;  %v464_v0 = vor.u32 1.1754944e-38, %v463_v30  ;;  %vm462_vm6 = vcmp.eq.f32.partialorder %v461_v33, 8.507059e+37  ;;  %v640_v30 = vld [vmem:[#allocation2 + $0xc8] sm:$0xff] }
 0x4ee   :  { %v446_v23 = vsel %vm445_vm1, %v425_v50, %v444_v20  ;;  %v519_v50 = vld [vmem:[%s1782_s4] sm:$0xff] }
 0x4ef   :  { %v449_v24 = vsel %vm447_vm2, %v448_v21, %v446_v23  ;;  %v644_v23 = vld [vmem:[#allocation2 + $0xf8] sm:$0xff] }
 0x4f0   :  { %v1278_v25 = vpop.eup %1277  ;;  %v451_v26 = vadd.f32 1e-06, %v449_v24  ;;  %v646_v24 = vld [vmem:[#allocation2 + $0x118] sm:$0xff]  ;;  %691 = vmatpush.msrb.mxu3 %v644_v23 }
 0x4f1   :  { %v453_v27 = vmul.f32 %v1278_v25, %v450_v8  ;;  %vm458_vm3 = vweird.f32 %v1278_v25  ;;  %667 = vmatpush.msra.mxu2 %v646_v24 }
 0x4f2   :  { %1279 = vrcp.f32 %v451_v26  ;;  %vm459_vm5 = vmor %vm457_vm4, %vm458_vm3  ;;  %v477_v42 = vand.u32 2147483648, %v451_v26  ;;  %v475_v44 = vand.u32 2147483647, %v451_v26  ;;  %vm471_vm8 = vweird.f32 %v451_v26 }
 0x4f3   :  { %v454_v29 = vsub.f32 1.0, %v453_v27  ;;  %v641_v27 = vld [vmem:[#allocation2 + $0xd0] sm:$0xff] }
 0x4f4   :  { %v478_v46 = vor.u32 1.1754944e-38, %v477_v42  ;;  %vm476_vm10 = vcmp.eq.f32.partialorder %v475_v44, 8.507059e+37  ;;  %692 = vmatpush.msrb.mxu3 %v641_v27 }
 0x4f5   :  { %v455_v31 = vmul.f32 %v1278_v25, %v454_v29  ;;  %v645_v29 = vld [vmem:[#allocation2 + $0x100] sm:$0xff] }
 0x4f7   :  { %v456_v34 = vadd.f32 %v1278_v25, %v455_v31  ;;  %v642_v31 = vld [vmem:[#allocation2 + $0xd8] sm:$0xff] }
 0x4f8   :  { %v1280_v35 = vpop.eup %1279 }
 0x4f9   :  { %v460_v37 = vsel %vm459_vm5, %v1278_v25, %v456_v34  ;;  %v467_v38 = vmul.f32 %v1280_v35, %v451_v26  ;;  %vm472_vm7 = vweird.f32 %v1280_v35  ;;  %v648_v25 = vld [vmem:[#allocation2 + $0x128] sm:$0xff]  ;;  %v643_v26 = vld [vmem:[#allocation2 + $0xf0] sm:$0xff] }
 0x4fa   :  { %v465_v39 = vsel %vm462_vm6, %v464_v0, %v460_v37  ;;  %vm473_vm9 = vmor %vm471_vm8, %vm472_vm7  ;;  %713 = vmatpush.msrb.mxu0 %v648_v25  ;;  %668 = vmatpush.msra.mxu2 %v643_v26  ;;  %v638_v34 = vld [vmem:[#allocation2 + $0xa8] sm:$0xff]  ;;  %v637_v0 = vld [vmem:[#allocation2 + $0xa0] sm:$0xff] }
 0x4fb   :  { %v480_v40 = vmul.f32 %v465_v39, %v1565_v36  ;;  %v468_v41 = vsub.f32 1.0, %v467_v38  ;;  %v520_v36 = vld [vmem:[%s1782_s4 + $0x8] sm:$0xff]  ;;  %v639_v37 = vld [vmem:[#allocation2 + $0xb0] sm:$0xff]  ;;  %693 = vmatpush.msrb.mxu3 %v638_v34 }
 0x4fc   :  { %549 = vmatpush.msra.mxu1 %v520_v36  ;;  %714 = vmatpush.msrb.mxu0 %v645_v29  ;;  %v1249_v34 = vld [vmem:[%s1783_s5 + $0xa] ss:$0 sm:$0xff] }
 0x4fd   :  { %1193 = vmatmul.msk.f32.vlgmr.msra.gmra.mxu0 %vm55_vm0, %v480_v40  ;;  %v469_v43 = vmul.f32 %v1280_v35, %v468_v41  ;;  %669 = vmatpush.msra.mxu2 %v640_v30 }
 0x4fe   :  { %550 = vmatpush.msra.mxu1 %v519_v50  ;;  %715 = vmatpush.msrb.mxu0 %v642_v31 }
 0x4ff   :  { %v470_v45 = vadd.f32 %v1280_v35, %v469_v43  ;;  %670 = vmatpush.msra.mxu2 %v637_v0 }
 0x500   :  { %716 = vmatpush.msrb.mxu0 %v639_v37 }
 0x501   :  { %v474_v47 = vsel %vm473_vm9, %v1280_v35, %v470_v45  ;;  %832 = vmatpush.msrb.mxu2 %v1451_v13 }
 0x502   :  { %v479_v48 = vsel %vm476_vm10, %v478_v46, %v474_v47 }
 0x503   :  { %v481_v49 = vmul.f32 %v479_v48, %v1571_v2  ;;  %833 = vmatpush.msrb.mxu2 %v1457_v14 }
 0x505   :  { %1194 = vmatmul.msk.f32.gmra.mxu0 %vm55_vm0, %v481_v49  ;;  %834 = vmatpush.msrb.mxu2 %v1463_v11 }
 0x507   :  { %835 = vmatpush.msrb.mxu2 %v1469_v15 }
 0x509   :  { %836 = vmatpush.msrb.mxu2 %v1475_v16 }
 0x50b   :  { %837 = vmatpush.msrb.mxu2 %v1481_v17 }
 0x50d   :  { %838 = vmatpush.msrb.mxu2 %v1487_v18 }
 0x50f   :  { %839 = vmatpush.msrb.mxu2 %v1493_v19 }
 0x57a   :  { %v511_v53 = vpop.f32.mrf.mxu0 }
 0x57b   :  { %v512_v54 = vadd.f32 %v1247_v52, %v511_v53 }
 0x57d   :  { %v517_v56 = vmax.f32 %v512_v54, 0.0 }
 0x57f   :  { %1195 = vmatmul.msk.f32.vlgmr.msra.gmra.mxu1 %vm300_vm13, %v517_v56 }
 0x582   :  { %v514_v2 = vpop.f32.mrf.mxu0 }
 0x583   :  { %v515_v57 = vadd.f32 %v1247_v52, %v514_v2 }
 0x585   :  { %v518_v58 = vmax.f32 %v515_v57, 0.0 }
 0x587   :  { %1196 = vmatmul.msk.f32.gmra.mxu1 %vm300_vm13, %v518_v58 }
 0x5fc   :  { %v552_v60 = vpop.f32.mrf.mxu1 }
 0x5fd   :  { %v553_v61 = vadd.f32 %v1248_v59, %v552_v60 }
 0x5ff   :  { %v1613_v62 = vadd.f32 %v553_v61, %v1555_v28 }
 0x601   :  { %v560_v63 = vsel %vm55_vm0, %v1613_v62, 0.0 }
 0x602   :  { %561 = vadd.xlane.f32.xlu1 %v560_v63 }
 0x604   :  { %v555_v1 = vpop.f32.mrf.mxu1 }
 0x605   :  { %v556_v3 = vadd.f32 %v1248_v59, %v555_v1 }
 0x607   :  { %v1618_v4 = vadd.f32 %v556_v3, %v1560_v32 }
 0x609   :  { %v563_v5 = vsel %vm55_vm0, %v1618_v4, 0.0 }
 0x60a   :  { %564 = vadd.xlane.f32.xlu2 %v563_v5 }
 0x675   :  { %v562_v7 = vpop.xlane.xlu1 %561 }
 0x676   :  { %v566_v8 = vmul.f32 0.03125, %v562_v7 }
 0x678   :  { %v1623_v9 = vsub.f32 %v1613_v62, %v566_v8 }
 0x67a   :  { %v570_v28 = vmul.f32 %v1623_v9, %v1623_v9 }
 0x67c   :  { %v572_v10 = vsel %vm55_vm0, %v570_v28, 0.0 }
 0x67d   :  { %v565_v12 = vpop.xlane.xlu2 %564  ;;  %573 = vadd.xlane.f32.xlu0 %v572_v10 }
 0x67e   :  { %v567_v6 = vmul.f32 0.03125, %v565_v12 }
 0x680   :  { %v1629_v32 = vsub.f32 %v1618_v4, %v567_v6 }
 0x682   :  { %v571_v20 = vmul.f32 %v1629_v32, %v1629_v32 }
 0x684   :  { %v575_v21 = vsel %vm55_vm0, %v571_v20, 0.0 }
 0x685   :  { %576 = vadd.xlane.f32.xlu1 %v575_v21 }
 0x6f0   :  { %v574_v33 = vpop.xlane.xlu0 %573 }
 0x6f1   :  { %v578_v35 = vmul.f32 0.032258064, %v574_v33 }
 0x6f3   :  { %1281 = vrsqrt.f32 %v578_v35  ;;  %vm587_vm11 = vcmp.eq.f32.partialorder %v578_v35, inf  ;;  %v590_v36 = vand.u32 2147483648, %v578_v35  ;;  %vm589_vm12 = vcmp.eq.f32.partialorder %v578_v35, 0.0 }
 0x6f8   :  { %v577_v38 = vpop.xlane.xlu1 %576 }
 0x6f9   :  { %v1282_v39 = vpop.eup %1281  ;;  %v579_v40 = vmul.f32 0.032258064, %v577_v38 }
 0x6fa   :  { %v581_v41 = vmul.f32 %v1282_v39, %v578_v35 }
 0x6fb   :  { %1283 = vrsqrt.f32 %v579_v40  ;;  %vm599_vm14 = vcmp.eq.f32.partialorder %v579_v40, inf  ;;  %v602_v58 = vand.u32 2147483648, %v579_v40  ;;  %vm601_vm15 = vcmp.eq.f32.partialorder %v579_v40, 0.0 }
 0x6fc   :  { %v582_v42 = vmul.f32 %v1282_v39, %v581_v41 }
 0x6fe   :  { %v583_v43 = vmul.f32 0.5, %v582_v42 }
 0x700   :  { %v584_v44 = vsub.f32 1.5, %v583_v43 }
 0x701   :  { %v1284_v45 = vpop.eup %1283 }
 0x702   :  { %v585_v46 = vmul.f32 %v1282_v39, %v584_v44  ;;  %v593_v47 = vmul.f32 %v1284_v45, %v579_v40 }
 0x704   :  { %v586_v48 = vmul.f32 %v585_v46, %v578_v35  ;;  %v594_v49 = vmul.f32 %v1284_v45, %v593_v47 }
 0x706   :  { %v588_v50 = vsel %vm587_vm11, %v578_v35, %v586_v48  ;;  %v595_v52 = vmul.f32 0.5, %v594_v49 }
 0x707   :  { %v591_v53 = vsel %vm589_vm12, %v590_v36, %v588_v50 }
 0x708   :  { %v604_v54 = vadd.f32 1e-06, %v591_v53  ;;  %v596_v56 = vsub.f32 1.5, %v595_v52 }
 0x70a   :  { %1285 = vrcp.f32 %v604_v54  ;;  %v597_v2 = vmul.f32 %v1284_v45, %v596_v56  ;;  %v617_v5 = vand.u32 2147483648, %v604_v54  ;;  %v615_v8 = vand.u32 2147483647, %v604_v54  ;;  %v1250_v56 = vld [vmem:[%s1783_s5 + $0x8] ss:$0 sm:$0xff] }
 0x70b   :  { %vm611_vm2 = vweird.f32 %v604_v54 }
 0x70c   :  { %v598_v57 = vmul.f32 %v597_v2, %v579_v40  ;;  %v618_v12 = vor.u32 1.1754944e-38, %v617_v5  ;;  %vm616_vm4 = vcmp.eq.f32.partialorder %v615_v8, 8.507059e+37 }
 0x70e   :  { %v600_v59 = vsel %vm599_vm14, %v579_v40, %v598_v57 }
 0x70f   :  { %v603_v60 = vsel %vm601_vm15, %v602_v58, %v600_v59 }
 0x710   :  { %v1286_v61 = vpop.eup %1285  ;;  %v605_v63 = vadd.f32 1e-06, %v603_v60 }
 0x711   :  { %v607_v1 = vmul.f32 %v1286_v61, %v604_v54  ;;  %vm612_vm1 = vweird.f32 %v1286_v61 }
 0x712   :  { %1287 = vrcp.f32 %v605_v63  ;;  %vm613_vm3 = vmor %vm611_vm2, %vm612_vm1  ;;  %v631_v24 = vand.u32 2147483648, %v605_v63  ;;  %v629_v26 = vand.u32 2147483647, %v605_v63  ;;  %vm625_vm6 = vweird.f32 %v605_v63 }
 0x713   :  { %v608_v3 = vsub.f32 1.0, %v607_v1 }
 0x714   :  { %v632_v29 = vor.u32 1.1754944e-38, %v631_v24  ;;  %vm630_vm8 = vcmp.eq.f32.partialorder %v629_v26, 8.507059e+37 }
 0x715   :  { %v609_v7 = vmul.f32 %v1286_v61, %v608_v3 }
 0x717   :  { %v610_v28 = vadd.f32 %v1286_v61, %v609_v7 }
 0x718   :  { %v1288_v10 = vpop.eup %1287 }
 0x719   :  { %v614_v6 = vsel %vm613_vm3, %v1286_v61, %v610_v28  ;;  %v621_v20 = vmul.f32 %v1288_v10, %v605_v63  ;;  %vm626_vm5 = vweird.f32 %v1288_v10  ;;  %v877_v61 = vld [vmem:[#allocation2 + $0x130] sm:$0xff]  ;;  %v876_v63 = vld [vmem:[#allocation2 + $0x108] sm:$0xff] }
 0x71a   :  { %v619_v21 = vsel %vm616_vm4, %v618_v12, %v614_v6  ;;  %vm627_vm7 = vmor %vm625_vm6, %vm626_vm5  ;;  %898 = vmatpush.msra.mxu0 %v877_v61  ;;  %v874_v12 = vld [vmem:[#allocation2 + $0xb8] sm:$0xff] }
 0x71b   :  { %v634_v22 = vmul.f32 %v619_v21, %v1623_v9  ;;  %v622_v23 = vsub.f32 1.0, %v621_v20 }
 0x71c   :  { %899 = vmatpush.msra.mxu0 %v876_v63 }
 0x71d   :  { %1197 = vmatmul.msk.f32.vlgmr.msra.gmra.mxu2 %vm55_vm0, %v634_v22  ;;  %1199 = vmatmul.msk.f32.vlgmr.msrb.gmra.mxu3 %vm55_vm0, %v634_v22  ;;  %v623_v25 = vmul.f32 %v1288_v10, %v622_v23 }
 0x71e   :  { %1201 = vmatmul.msk.f32.vlgmr.msrb.gmra.mxu0 %vm55_vm0, %v634_v22 }
 0x71f   :  { %v624_v27 = vadd.f32 %v1288_v10, %v623_v25 }
 0x721   :  { %v628_v30 = vsel %vm627_vm7, %v1288_v10, %v624_v27  ;;  %v875_v10 = vld [vmem:[#allocation2 + $0xe0] sm:$0xff]  ;;  %v1252_v27 = vld [vmem:[%s1783_s5 + $0xb] ss:$0 sm:$0xff] }
 0x722   :  { %v633_v31 = vsel %vm630_vm8, %v632_v29, %v628_v30  ;;  %900 = vmatpush.msra.mxu0 %v875_v10 }
 0x723   :  { %v635_v9 = vmul.f32 %v633_v31, %v1629_v32  ;;  %v1251_v32 = vld [vmem:[%s1783_s5 + $0x9] ss:$0 sm:$0xff] }
 0x724   :  { %901 = vmatpush.msra.mxu0 %v874_v12 }
 0x725   :  { %1198 = vmatmul.msk.f32.gmra.mxu2 %vm55_vm0, %v635_v9  ;;  %1200 = vmatmul.msk.f32.gmra.mxu3 %vm55_vm0, %v635_v9 }
 0x726   :  { %1202 = vmatmul.msk.f32.gmra.mxu0 %vm55_vm0, %v635_v9 }
 0x79b   :  { %v718_v33 = vpop.f32.mrf.mxu0 }
 0x79c   :  { %v735_v37 = vadd.f32 %v1249_v34, %v718_v33 }
 0x79e   :  { %v751_v41 = vmul.f32 %v735_v37, %v1457_v14  ;;  %v749_v46 = vmul.f32 %v735_v37, %v1469_v15  ;;  %v747_v49 = vmul.f32 %v735_v37, %v1481_v17  ;;  %v745_v50 = vmul.f32 %v735_v37, %v1493_v19 }
 0x7a0   :  { %v695_v35 = vpop.f32.mrf.mxu3  ;;  %v672_v54 = vpop.f32.mrf.mxu2 }
 0x7a1   :  { %v731_v44 = vadd.f32 %v1251_v32, %v695_v35 }
 0x7a3   :  { %v721_v0 = vpop.f32.mrf.mxu0  ;;  %v743_v48 = vmul.f32 %v731_v44, %v1457_v14  ;;  %v741_v52 = vmul.f32 %v731_v44, %v1469_v15  ;;  %v739_v53 = vmul.f32 %v731_v44, %v1481_v17  ;;  %v737_v15 = vmul.f32 %v731_v44, %v1493_v19  ;;  %v990_v44 = vld [vmem:[#allocation2 + $0x138] sm:$0xff] }
 0x7a4   :  { %v736_v38 = vadd.f32 %v1249_v34, %v721_v0  ;;  %1011 = vmatpush.msra.mxu2 %v990_v44 }
 0x7a6   :  { %v752_v39 = vmul.f32 %v736_v38, %v1451_v13  ;;  %v750_v43 = vmul.f32 %v736_v38, %v1463_v11  ;;  %v748_v47 = vmul.f32 %v736_v38, %v1475_v16  ;;  %v746_v36 = vmul.f32 %v736_v38, %v1487_v18 }
 0x7a8   :  { %855 = vmatpush.msra.mxu3 %v752_v39  ;;  %v698_v40 = vpop.f32.mrf.mxu3  ;;  %v675_v2 = vpop.f32.mrf.mxu2 }
 0x7a9   :  { %v732_v42 = vadd.f32 %v1251_v32, %v698_v40  ;;  %v728_v17 = vadd.f32 %v1250_v56, %v675_v2 }
 0x7aa   :  { %856 = vmatpush.msra.mxu3 %v751_v41 }
 0x7ab   :  { %v744_v45 = vmul.f32 %v732_v42, %v1451_v13  ;;  %v742_v13 = vmul.f32 %v732_v42, %v1463_v11  ;;  %v740_v14 = vmul.f32 %v732_v42, %v1475_v16  ;;  %v738_v11 = vmul.f32 %v732_v42, %v1487_v18 }
 0x7ac   :  { %857 = vmatpush.msra.mxu3 %v750_v43  ;;  %v727_v16 = vadd.f32 %v1250_v56, %v672_v54 }
 0x7ad   :  { %1206 = vmatpush.xpose.msk.msrb.mxu1 %vm55_vm0, %v744_v45  ;;  %v989_v45 = vld [vmem:[#allocation2 + $0x110] sm:$0xff] }
 0x7ae   :  { %858 = vmatpush.msra.mxu3 %v749_v46  ;;  %v988_v46 = vld [vmem:[#allocation2 + $0xe8] sm:$0xff]  ;;  %1012 = vmatpush.msra.mxu2 %v989_v45 }
 0x7b0   :  { %859 = vmatpush.msra.mxu3 %v748_v47  ;;  %1013 = vmatpush.msra.mxu2 %v988_v46 }
 0x7b1   :  { %1207 = vmatpush.xpose.msk.msrb.mxu1 %vm55_vm0, %v743_v48  ;;  %v987_v48 = vld [vmem:[#allocation2 + $0xc0] sm:$0xff] }
 0x7b2   :  { %860 = vmatpush.msra.mxu3 %v747_v49  ;;  %1014 = vmatpush.msra.mxu2 %v987_v48 }
 0x7b4   :  { %861 = vmatpush.msra.mxu3 %v746_v36 }
 0x7b5   :  { %1208 = vmatpush.xpose.msk.msrb.mxu1 %vm55_vm0, %v742_v13 }
 0x7b6   :  { %862 = vmatpush.msra.mxu3 %v745_v50 }
 0x7b9   :  { %1209 = vmatpush.xpose.msk.msrb.mxu1 %vm55_vm0, %v741_v52 }
 0x7bd   :  { %1210 = vmatpush.xpose.msk.msrb.mxu1 %vm55_vm0, %v740_v14 }
 0x7c1   :  { %1211 = vmatpush.xpose.msk.msrb.mxu1 %vm55_vm0, %v739_v53 }
 0x7c5   :  { %1212 = vmatpush.xpose.msk.msrb.mxu1 %vm55_vm0, %v738_v11 }
 0x7c9   :  { %1213 = vmatpush.xpose.msk.msrb.mxu1 %vm55_vm0, %v737_v15 }
 0x7cc   :  { %1214 = vmatmul.msk.f32.vlgmr.msrb.gmra.mxu1 %vm55_vm0, %v727_v16 }
 0x7d4   :  { %1215 = vmatmul.msk.f32.gmra.mxu1 %vm55_vm0, %v728_v17 }
 0x849   :  { %v800_v57 = vpop.f32.mrf.mxu1 }
 0x84a   :  { %v801_v18 = vadd.f32 %v800_v57, %v1534_v51  ;;  %v1233_v57 = vld [vmem:[%s1782_s4 + $0x78] sm:$0xff] }
 0x84b   :  { %1049 = vmatpush.msrb.mxu3 %v1233_v57 }
 0x84c   :  { %v806_v58 = vsel %vm300_vm13, %v801_v18, -inf }
 0x84d   :  { %807 = vmax.xlane.f32.xlu2 %v806_v58 }
 0x851   :  { %v803_v59 = vpop.f32.mrf.mxu1 }
 0x852   :  { %v804_v60 = vadd.f32 %v803_v59, %v1541_v55 }
 0x854   :  { %v809_v19 = vsel %vm300_vm13, %v804_v60, -inf }
 0x855   :  { %810 = vmax.xlane.f32.xlu0 %v809_v19  ;;  %v1231_v19 = vld [vmem:[%s1782_s4 + $0x68] sm:$0xff] }
 0x8c0   :  { %v808_v1 = vpop.xlane.xlu2 %807 }
 0x8c1   :  { %v812_v3 = vsub.f32 %v801_v18, %v808_v1  ;;  %v1232_v18 = vld [vmem:[%s1782_s4 + $0x70] sm:$0xff]  ;;  %v1230_v1 = vld [vmem:[%s1782_s4 + $0x60] sm:$0xff] }
 0x8c2   :  { %1050 = vmatpush.msrb.mxu3 %v1232_v18 }
 0x8c3   :  { %v814_v5 = vmul.f32 1.442695, %v812_v3 }
 0x8c4   :  { %1051 = vmatpush.msrb.mxu3 %v1231_v19 }
 0x8c5   :  { %1289 = vpow2.f32 %v814_v5  ;;  %v1229_v5 = vld [vmem:[%s1782_s4 + $0x58] sm:$0xff] }
 0x8c6   :  { %1052 = vmatpush.msrb.mxu3 %v1230_v1 }
 0x8c8   :  { %v811_v7 = vpop.xlane.xlu0 %810  ;;  %1053 = vmatpush.msrb.mxu3 %v1229_v5 }
 0x8c9   :  { %v813_v8 = vsub.f32 %v804_v60, %v811_v7 }
 0x8cb   :  { %v1290_v51 = vpop.eup %1289  ;;  %v816_v28 = vmul.f32 1.442695, %v813_v8 }
 0x8cc   :  { %1216 = vmatmul.msk.f32.vlgmr.msrb.gmra.mxu2 %vm300_vm13, %v1290_v51  ;;  %1218 = vmatmul.msk.f32.vlgmr.msra.gmra.mxu3 %vm300_vm13, %v1290_v51  ;;  %v1228_v51 = vld [vmem:[%s1782_s4 + $0x50] sm:$0xff] }
 0x8cd   :  { %1291 = vpow2.f32 %v816_v28  ;;  %1054 = vmatpush.msrb.mxu3 %v1228_v51 }
 0x8d3   :  { %v1292_v55 = vpop.eup %1291 }
 0x8d4   :  { %1217 = vmatmul.msk.f32.gmra.mxu2 %vm300_vm13, %v1292_v55  ;;  %1219 = vmatmul.msk.f32.gmra.mxu3 %vm300_vm13, %v1292_v55 }
 0x94f   :  { %v841_v6 = vpop.f32.mrf.mxu2  ;;  %v864_v20 = vpop.f32.mrf.mxu3 }
 0x950   :  { %1293 = vrcp.f32 %v841_v6 }
 0x956   :  { %v1294_v21 = vpop.eup %1293 }
 0x957   :  { %v872_v22 = vmul.f32 %v1294_v21, %v864_v20  ;;  %v844_v23 = vpop.f32.mrf.mxu2  ;;  %v867_v25 = vpop.f32.mrf.mxu3 }
 0x958   :  { %1295 = vrcp.f32 %v844_v23 }
 0x959   :  { %1221 = vmatmul.msk.f32.vlgmr.msra.gmra.mxu0 %vm55_vm0, %v872_v22 }
 0x95e   :  { %v1296_v24 = vpop.eup %1295 }
 0x95f   :  { %v873_v26 = vmul.f32 %v1296_v24, %v867_v25 }
 0x961   :  { %1222 = vmatmul.msk.f32.gmra.mxu0 %vm55_vm0, %v873_v26 }
 0x9d6   :  { %v903_v29 = vpop.f32.mrf.mxu0 }
 0x9d7   :  { %v904_v30 = vadd.f32 %v1252_v27, %v903_v29 }
 0x9d9   :  { %v1699_v31 = vadd.f32 %v904_v30, %v1613_v62 }
 0x9db   :  { %v911_v9 = vsel %vm55_vm0, %v1699_v31, 0.0 }
 0x9dc   :  { %912 = vadd.xlane.f32.xlu1 %v911_v9 }
 0x9de   :  { %v906_v33 = vpop.f32.mrf.mxu0 }
 0x9df   :  { %v907_v34 = vadd.f32 %v1252_v27, %v906_v33 }
 0x9e1   :  { %v1704_v35 = vadd.f32 %v907_v34, %v1618_v4 }
 0x9e3   :  { %v914_v0 = vsel %vm55_vm0, %v1704_v35, 0.0 }
 0x9e4   :  { %915 = vadd.xlane.f32.xlu2 %v914_v0 }
 0xa4f   :  { %v913_v37 = vpop.xlane.xlu1 %912 }
 0xa50   :  { %v917_v38 = vmul.f32 0.03125, %v913_v37 }
 0xa52   :  { %v1709_v39 = vsub.f32 %v1699_v31, %v917_v38 }
 0xa54   :  { %v921_v62 = vmul.f32 %v1709_v39, %v1709_v39 }
 0xa56   :  { %v923_v32 = vsel %vm55_vm0, %v921_v62, 0.0 }
 0xa57   :  { %924 = vadd.xlane.f32.xlu0 %v923_v32  ;;  %v916_v40 = vpop.xlane.xlu2 %915 }
 0xa58   :  { %v918_v41 = vmul.f32 0.03125, %v916_v40 }
 0xa5a   :  { %v1715_v4 = vsub.f32 %v1704_v35, %v918_v41 }
 0xa5c   :  { %v922_v42 = vmul.f32 %v1715_v4, %v1715_v4 }
 0xa5e   :  { %v926_v43 = vsel %vm55_vm0, %v922_v42, 0.0  ;;  %v1226_v42 = vld [vmem:[%s1782_s4 + $0x40] sm:$0xff] }
 0xa5f   :  { %927 = vadd.xlane.f32.xlu1 %v926_v43  ;;  %v1253_v43 = vld [vmem:[%s1783_s5 + $0xc] ss:$0 sm:$0xff] }
 0xaca   :  { %v925_v47 = vpop.xlane.xlu0 %924 }
 0xacb   :  { %v929_v49 = vmul.f32 0.032258064, %v925_v47 }
 0xacd   :  { %1297 = vrsqrt.f32 %v929_v49  ;;  %vm938_vm9 = vcmp.eq.f32.partialorder %v929_v49, inf  ;;  %v941_v17 = vand.u32 2147483648, %v929_v49  ;;  %vm940_vm10 = vcmp.eq.f32.partialorder %v929_v49, 0.0 }
 0xad2   :  { %v928_v36 = vpop.xlane.xlu1 %927 }
 0xad3   :  { %v1298_v13 = vpop.eup %1297  ;;  %v930_v50 = vmul.f32 0.032258064, %v928_v36 }
 0xad4   :  { %v932_v52 = vmul.f32 %v1298_v13, %v929_v49 }
 0xad5   :  { %1299 = vrsqrt.f32 %v930_v50  ;;  %vm950_vm11 = vcmp.eq.f32.partialorder %v930_v50, inf  ;;  %v953_v8 = vand.u32 2147483648, %v930_v50  ;;  %vm952_vm12 = vcmp.eq.f32.partialorder %v930_v50, 0.0 }
 0xad6   :  { %v933_v14 = vmul.f32 %v1298_v13, %v932_v52 }
 0xad8   :  { %v934_v53 = vmul.f32 0.5, %v933_v14 }
 0xada   :  { %v935_v11 = vsub.f32 1.5, %v934_v53 }
 0xadb   :  { %v1300_v54 = vpop.eup %1299 }
 0xadc   :  { %v936_v56 = vmul.f32 %v1298_v13, %v935_v11  ;;  %v944_v15 = vmul.f32 %v1300_v54, %v930_v50 }
 0xade   :  { %v937_v16 = vmul.f32 %v936_v56, %v929_v49  ;;  %v945_v2 = vmul.f32 %v1300_v54, %v944_v15 }
 0xae0   :  { %v939_v58 = vsel %vm938_vm9, %v929_v49, %v937_v16  ;;  %v946_v59 = vmul.f32 0.5, %v945_v2  ;;  %v1254_v49 = vld [vmem:[%s1783_s5 + $0xd] ss:$0 sm:$0xff] }
 0xae1   :  { %v942_v60 = vsel %vm940_vm10, %v941_v17, %v939_v58 }
 0xae2   :  { %v955_v61 = vadd.f32 1e-06, %v942_v60  ;;  %v947_v63 = vsub.f32 1.5, %v946_v59 }
 0xae4   :  { %1301 = vrcp.f32 %v955_v61  ;;  %v948_v3 = vmul.f32 %v1300_v54, %v947_v63  ;;  %v968_v21 = vand.u32 2147483648, %v955_v61  ;;  %v966_v23 = vand.u32 2147483647, %v955_v61 }
 0xae5   :  { %vm962_vm15 = vweird.f32 %v955_v61 }
 0xae6   :  { %v949_v7 = vmul.f32 %v948_v3, %v930_v50  ;;  %v969_v26 = vor.u32 1.1754944e-38, %v968_v21  ;;  %vm967_vm2 = vcmp.eq.f32.partialorder %v966_v23, 8.507059e+37 }
 0xae8   :  { %v951_v28 = vsel %vm950_vm11, %v930_v50, %v949_v7 }
 0xae9   :  { %v954_v55 = vsel %vm952_vm12, %v953_v8, %v951_v28 }
 0xaea   :  { %v1302_v10 = vpop.eup %1301  ;;  %v956_v12 = vadd.f32 1e-06, %v954_v55 }
 0xaeb   :  { %v958_v6 = vmul.f32 %v1302_v10, %v955_v61  ;;  %vm963_vm14 = vweird.f32 %v1302_v10 }
 0xaec   :  { %1303 = vrcp.f32 %v956_v12  ;;  %vm964_vm1 = vmor %vm962_vm15, %vm963_vm14  ;;  %v982_v34 = vand.u32 2147483648, %v956_v12  ;;  %v980_v37 = vand.u32 2147483647, %v956_v12  ;;  %vm976_vm4 = vweird.f32 %v956_v12 }
 0xaed   :  { %v959_v20 = vsub.f32 1.0, %v958_v6 }
 0xaee   :  { %v983_v62 = vor.u32 1.1754944e-38, %v982_v34  ;;  %vm981_vm6 = vcmp.eq.f32.partialorder %v980_v37, 8.507059e+37 }
 0xaef   :  { %v960_v22 = vmul.f32 %v1302_v10, %v959_v20 }
 0xaf1   :  { %v961_v24 = vadd.f32 %v1302_v10, %v960_v22 }
 0xaf2   :  { %v1304_v25 = vpop.eup %1303 }
 0xaf3   :  { %v965_v27 = vsel %vm964_vm1, %v1302_v10, %v961_v24  ;;  %v972_v29 = vmul.f32 %v1304_v25, %v956_v12  ;;  %vm977_vm3 = vweird.f32 %v1304_v25 }
 0xaf4   :  { %v970_v30 = vsel %vm967_vm2, %v969_v26, %v965_v27  ;;  %vm978_vm5 = vmor %vm976_vm4, %vm977_vm3 }
 0xaf5   :  { %v985_v9 = vmul.f32 %v970_v30, %v1709_v39  ;;  %v973_v33 = vsub.f32 1.0, %v972_v29  ;;  %v1227_v39 = vld [vmem:[%s1782_s4 + $0x48] sm:$0xff] }
 0xaf6   :  { %1055 = vmatpush.msrb.mxu3 %v1227_v39 }
 0xaf7   :  { %1224 = vmatmul.msk.f32.vlgmr.msra.gmra.mxu2 %vm55_vm0, %v985_v9  ;;  %v974_v0 = vmul.f32 %v1304_v25, %v973_v33 }
 0xaf8   :  { %1056 = vmatpush.msrb.mxu3 %v1226_v42  ;;  %v1255_v42 = vld [vmem:[%s1784_s6] ss:$0 sm:$0xff] }
 0xaf9   :  { %v975_v38 = vadd.f32 %v1304_v25, %v974_v0 }
 0xafb   :  { %v979_v32 = vsel %vm978_vm5, %v1304_v25, %v975_v38 }
 0xafc   :  { %v984_v40 = vsel %vm981_vm6, %v983_v62, %v979_v32 }
 0xafd   :  { %v986_v41 = vmul.f32 %v984_v40, %v1715_v4 }
 0xaff   :  { %1225 = vmatmul.msk.f32.gmra.mxu2 %vm55_vm0, %v986_v41 }
 0xb7a   :  { %v1016_v44 = vpop.f32.mrf.mxu2 }
 0xb7b   :  { %v1017_v45 = vadd.f32 %v1253_v43, %v1016_v44 }
 0xb7d   :  { %v1022_v46 = vmax.f32 %v1017_v45, 0.0 }
 0xb7f   :  { %1235 = vmatmul.msk.f32.vlgmr.msrb.gmra.mxu3 %vm300_vm13, %v1022_v46  ;;  %v1256_v46 = vld [vmem:[%s1784_s6 + $0x1] ss:$0 sm:$0xff] }
 0xb82   :  { %v1019_v4 = vpop.f32.mrf.mxu2 }
 0xb83   :  { %v1020_v47 = vadd.f32 %v1253_v43, %v1019_v4 }
 0xb85   :  { %v1023_v48 = vmax.f32 %v1020_v47, 0.0 }
 0xb87   :  { %1236 = vmatmul.msk.f32.gmra.mxu3 %vm300_vm13, %v1023_v48 }
 0xc02   :  { %v1058_v36 = vpop.f32.mrf.mxu3 }
 0xc03   :  { %v1059_v13 = vadd.f32 %v1254_v49, %v1058_v36 }
 0xc05   :  { %v1064_v50 = vadd.f32 %v1059_v13, %v1699_v31 }
 0xc07   :  { %v1067_v52 = vsel %vm55_vm0, %v1064_v50, 0.0 }
 0xc08   :  { %1068 = vadd.xlane.f32.xlu2 %v1067_v52 }
 0xc0a   :  { %v1061_v14 = vpop.f32.mrf.mxu3 }
 0xc0b   :  { %v1062_v53 = vadd.f32 %v1254_v49, %v1061_v14 }
 0xc0d   :  { %v1065_v11 = vadd.f32 %v1062_v53, %v1704_v35 }
 0xc0f   :  { %v1070_v54 = vsel %vm55_vm0, %v1065_v11, 0.0 }
 0xc10   :  { %1071 = vadd.xlane.f32.xlu0 %v1070_v54 }
 0xc7b   :  { %v1069_v56 = vpop.xlane.xlu2 %1068 }
 0xc7c   :  { %v1073_v15 = vmul.f32 0.03125, %v1069_v56 }
 0xc7e   :  { %v1075_v16 = vsub.f32 %v1064_v50, %v1073_v15 }
 0xc80   :  { %v1077_v2 = vmul.f32 %v1075_v16, %v1075_v16 }
 0xc82   :  { %v1079_v17 = vsel %vm55_vm0, %v1077_v2, 0.0 }
 0xc83   :  { %v1072_v57 = vpop.xlane.xlu0 %1071  ;;  %1080 = vadd.xlane.f32.xlu1 %v1079_v17 }
 0xc84   :  { %v1074_v18 = vmul.f32 0.03125, %v1072_v57 }
 0xc86   :  { %v1761_v31 = vsub.f32 %v1065_v11, %v1074_v18 }
 0xc88   :  { %v1078_v58 = vmul.f32 %v1761_v31, %v1761_v31 }
 0xc8a   :  { %v1082_v59 = vsel %vm55_vm0, %v1078_v58, 0.0 }
 0xc8b   :  { %1083 = vadd.xlane.f32.xlu2 %v1082_v59 }
 0xcf6   :  { %v1081_v35 = vpop.xlane.xlu1 %1080 }
 0xcf7   :  { %v1085_v60 = vmul.f32 0.032258064, %v1081_v35 }
 0xcf9   :  { %1305 = vrsqrt.f32 %v1085_v60  ;;  %vm1094_vm13 = vcmp.eq.f32.partialorder %v1085_v60, inf  ;;  %v1097_v12 = vand.u32 2147483648, %v1085_v60  ;;  %vm1096_vm7 = vcmp.eq.f32.partialorder %v1085_v60, 0.0 }
 0xcfe   :  { %v1084_v19 = vpop.xlane.xlu2 %1083 }
 0xcff   :  { %v1306_v61 = vpop.eup %1305  ;;  %v1086_v63 = vmul.f32 0.032258064, %v1084_v19 }
 0xd00   :  { %v1088_v1 = vmul.f32 %v1306_v61, %v1085_v60 }
 0xd01   :  { %1307 = vrsqrt.f32 %v1086_v63  ;;  %vm1106_vm8 = vcmp.eq.f32.partialorder %v1086_v63, inf  ;;  %v1109_v26 = vand.u32 2147483648, %v1086_v63  ;;  %vm1108_vm9 = vcmp.eq.f32.partialorder %v1086_v63, 0.0 }
 0xd02   :  { %v1089_v3 = vmul.f32 %v1306_v61, %v1088_v1 }
 0xd04   :  { %v1090_v5 = vmul.f32 0.5, %v1089_v3 }
 0xd06   :  { %v1091_v7 = vsub.f32 1.5, %v1090_v5 }
 0xd07   :  { %v1308_v8 = vpop.eup %1307 }
 0xd08   :  { %v1092_v51 = vmul.f32 %v1306_v61, %v1091_v7  ;;  %v1100_v28 = vmul.f32 %v1308_v8, %v1086_v63 }
 0xd0a   :  { %v1093_v55 = vmul.f32 %v1092_v51, %v1085_v60  ;;  %v1101_v10 = vmul.f32 %v1308_v8, %v1100_v28 }
 0xd0c   :  { %v1095_v6 = vsel %vm1094_vm13, %v1085_v60, %v1093_v55  ;;  %v1102_v20 = vmul.f32 0.5, %v1101_v10 }
 0xd0d   :  { %v1098_v21 = vsel %vm1096_vm7, %v1097_v12, %v1095_v6 }
 0xd0e   :  { %v1111_v22 = vadd.f32 1e-06, %v1098_v21  ;;  %v1103_v23 = vsub.f32 1.5, %v1102_v20 }
 0xd10   :  { %1309 = vrcp.f32 %v1111_v22  ;;  %v1104_v24 = vmul.f32 %v1308_v8, %v1103_v23  ;;  %v1124_v0 = vand.u32 2147483648, %v1111_v22  ;;  %v1122_v38 = vand.u32 2147483647, %v1111_v22 }
 0xd11   :  { %vm1118_vm11 = vweird.f32 %v1111_v22 }
 0xd12   :  { %v1105_v25 = vmul.f32 %v1104_v24, %v1086_v63  ;;  %v1125_v40 = vor.u32 1.1754944e-38, %v1124_v0  ;;  %vm1123_vm14 = vcmp.eq.f32.partialorder %v1122_v38, 8.507059e+37 }
 0xd14   :  { %v1107_v27 = vsel %vm1106_vm8, %v1086_v63, %v1105_v25 }
 0xd15   :  { %v1110_v29 = vsel %vm1108_vm9, %v1109_v26, %v1107_v27 }
 0xd16   :  { %v1310_v30 = vpop.eup %1309  ;;  %v1112_v9 = vadd.f32 1e-06, %v1110_v29 }
 0xd17   :  { %v1114_v33 = vmul.f32 %v1310_v30, %v1111_v22  ;;  %vm1119_vm10 = vweird.f32 %v1310_v30 }
 0xd18   :  { %1311 = vrcp.f32 %v1112_v9  ;;  %vm1120_vm12 = vmor %vm1118_vm11, %vm1119_vm10  ;;  %v1138_v4 = vand.u32 2147483648, %v1112_v9  ;;  %v1136_v48 = vand.u32 2147483647, %v1112_v9  ;;  %vm1132_vm1 = vweird.f32 %v1112_v9 }
 0xd19   :  { %v1115_v34 = vsub.f32 1.0, %v1114_v33 }
 0xd1a   :  { %v1139_v50 = vor.u32 1.1754944e-38, %v1138_v4  ;;  %vm1137_vm3 = vcmp.eq.f32.partialorder %v1136_v48, 8.507059e+37 }
 0xd1b   :  { %v1116_v37 = vmul.f32 %v1310_v30, %v1115_v34 }
 0xd1d   :  { %v1117_v62 = vadd.f32 %v1310_v30, %v1116_v37 }
 0xd1e   :  { %v1312_v32 = vpop.eup %1311 }
 0xd1f   :  { %v1121_v41 = vsel %vm1120_vm12, %v1310_v30, %v1117_v62  ;;  %v1128_v39 = vmul.f32 %v1312_v32, %v1112_v9  ;;  %vm1133_vm15 = vweird.f32 %v1312_v32 }
 0xd20   :  { %v1126_v43 = vsel %vm1123_vm14, %v1125_v40, %v1121_v41  ;;  %vm1134_vm2 = vmor %vm1132_vm1, %vm1133_vm15 }
 0xd21   :  { %v1129_v44 = vsub.f32 1.0, %v1128_v39  ;;  %v1141_v45 = vmul.f32 %v1126_v43, %v1075_v16 }
 0xd23   :  { %v1130_v47 = vmul.f32 %v1312_v32, %v1129_v44  ;;  %v1144_v49 = vmul.f32 %v1255_v42, %v1141_v45 }
 0xd25   :  { %v1131_v36 = vadd.f32 %v1312_v32, %v1130_v47  ;;  %v1148_v13 = vadd.f32 %v1256_v46, %v1144_v49 }
 0xd27   :  { %v1135_v52 = vsel %vm1134_vm2, %v1312_v32, %v1131_v36  ;;  %1150 = vst.msk [vmem:[#allocation5] sm:$0xff] %vm55_vm0, %v1148_v13 }
 0xd28   :  { %v1140_v14 = vsel %vm1137_vm3, %v1139_v50, %v1135_v52 }
 0xd29   :  { %v1142_v53 = vmul.f32 %v1140_v14, %v1761_v31 }
 0xd2b   :  { %v1145_v11 = vmul.f32 %v1255_v42, %v1142_v53 }
 0xd2d   :  { %v1149_v54 = vadd.f32 %v1256_v46, %v1145_v11 }
 0xd2f   :  { %1151 = vst.msk [vmem:[#allocation5 + $0x8] sm:$0xff] %vm55_vm0, %v1149_v54 }
 0xd30   :  { %1164 = dma.vmem_to_hbm [thread:$0]  %s1157_s10, 256, %s1159_s0, [#allocation4], %s1369_s11, %s1369_s11, %s1370_s12  }
 0xd31   :  { %1363 = dma.done.wait [#allocation4], 256  }
 0xd32   :  { %1364 = vsyncadd [#allocation4], 4294967040 }
 0xd33   :  { %1169 = vsyncpa [#allocation3], 1 }
 0xd34   :  { %1170 = vsyncpa [#allocation4], 1 }

</bundles_post_ra>
